<compile_context>
chip_gen: v5e
topology: v5e:2x2
jax: 0.10.0
libtpu: 0.0.40
codegen_flags: <defaults>
</compile_context>

<pallas_src>
import functools

import jax
import jax.numpy as jnp
from jax.experimental import pallas as pl
from jax.experimental.pallas import tpu as pltpu

C1OUT = 32    # conv1 output channels
C2OUT = 64    # conv2 output channels
FC1OUT = 64   # fc1 output features


# ----------------------------- fused Pallas kernel -------------------------

def _make_fused_kernel(B, H, W, Cin):
    H2, W2 = H // 2, W // 2
    H4, W4 = H2 // 2, W2 // 2
    RP1 = H + 2              # padded rows per image (host-padded conv1 input)
    RP2 = H2 + 2             # padded rows per image (conv2 input scratch)
    R1 = B * RP1 - 2         # conv1 output rows (incl. never-read junk rows)
    R2 = B * RP2 - 2         # conv2 output rows (ditto)
    P2L = (W - 1) * C1OUT    # lanes kept after the W-direction pool-max shift

    def kernel(x_ref, w1_ref, b1_ref, w2_ref, b2_ref, w3_ref, b3_ref,
               w4_ref, b4_ref, o_ref, c1_ref, p2_ref, c2_ref, feat_ref):
        f32 = jnp.float32

        # ---------- conv1 (3x3, pad 1) + ReLU: 3 per-dy matmuls --------------
        # x layout: rows = b*(H+2)+padded_h, lanes = padded_w*Cin + ci (host-padded).
        # c1 layout: rows = b*(H+2)+h (valid h < H, rows h in {H,H+1} are junk),
        #            lanes = w*32 + c.
        acc1 = jnp.dot(x_ref[0:R1, :], w1_ref[0], preferred_element_type=f32)
        for dy in range(1, 3):
            acc1 = acc1 + jnp.dot(x_ref[dy:dy + R1, :], w1_ref[dy],
                                  preferred_element_type=f32)
        c1_ref[...] = jnp.maximum(acc1 + b1_ref[...], 0.0)

        # ---------- maxpool1 (2x2 / stride 2) -> conv2 input -----------------
        # p2 layout: rows = b*(H2+2)+padded_h2, lanes = w*32 + c for w in
        # {0..W-2}; the pooled value for w2=j sits at even w=2j, odd-w lanes
        # hold finite junk that the conv2 weights zero out.  Only the 2 pad
        # rows per image are zeroed (interior rows are fully overwritten).
        zrow = jnp.zeros((1, P2L), f32)
        for b in range(B):
            p2_ref[b * RP2: b * RP2 + 1, :] = zrow
            p2_ref[b * RP2 + H2 + 1: b * RP2 + H2 + 2, :] = zrow
            ev = c1_ref[pl.ds(b * RP1, H2, stride=2), :]       # h = 0,2,...
            od = c1_ref[pl.ds(b * RP1 + 1, H2, stride=2), :]   # h = 1,3,...
            rmax = jnp.maximum(ev, od)                          # (H2, W*32)
            mm = jnp.maximum(rmax[:, :P2L], rmax[:, C1OUT:])    # pooled at even w
            p2_ref[b * RP2 + 1: b * RP2 + 1 + H2, :] = mm       # one full-row store

        # ---------- conv2 (3x3, pad 1) + ReLU: 3 per-dy matmuls --------------
        # c2 layout: rows = b*(H2+2)+h2 (valid h2 < H2, rest junk), lanes = w2*64 + c.
        acc2 = jnp.dot(p2_ref[0:R2, :], w2_ref[0], preferred_element_type=f32)
        for dy in range(1, 3):
            acc2 = acc2 + jnp.dot(p2_ref[dy:dy + R2, :], w2_ref[dy],
                                  preferred_element_type=f32)
        c2_ref[...] = jnp.maximum(acc2 + b2_ref[...], 0.0)

        # ---------- maxpool2 + flatten into lane-dense (B, H4*W4*64) ---------
        for b in range(B):
            ev = c2_ref[pl.ds(b * RP2, H4, stride=2), :]
            od = c2_ref[pl.ds(b * RP2 + 1, H4, stride=2), :]
            rmax = jnp.maximum(ev, od)                               # (H4, W2*64)
            pooled = jnp.maximum(rmax[:, :C2OUT], rmax[:, C2OUT:])   # (H4, 64)
            for h4 in range(H4 * W4):
                feat_ref[b:b + 1, h4 * C2OUT:(h4 + 1) * C2OUT] = pooled[h4:h4 + 1, :]

        # ---------- fc1 + ReLU + fc2: one (B,960)x(960,64), one (B,64)x(64,NC)
        hidden = jnp.maximum(
            jnp.dot(feat_ref[...], w3_ref[...], preferred_element_type=f32)
            + b3_ref[...], 0.0)
        logits = jnp.dot(hidden, w4_ref[...],
                         preferred_element_type=f32) + b4_ref[...]
        o_ref[...] = logits.astype(o_ref.dtype)

    return kernel


# --------------------------------- wrapper ---------------------------------

def cnn_forward(x_nchw, kp):
    B, Cin, H, W = x_nchw.shape
    if H % 4 != 0 or W % 4 != 0:
        raise ValueError(f"spatial dims ({H},{W}) must be divisible by 4 "
                         "(two 2x2/stride-2 max-pools)")
    if (H // 4) * (W // 4) != 15:
        raise ValueError(f"fc1 expects 64*15*1 flattened features, but "
                         f"({H},{W}) pools to {(H // 4)}x{(W // 4)}")
    num_classes = kp["b4"].shape[-1]
    H2, W2 = H // 2, W // 2
    H4, W4 = H // 4, W // 4

    # One-time host-side layout + zero-pad: NCHW -> rows=(b,padded_h),
    # lanes=(padded_w, ci).  Doing the pad here removes the in-kernel masked
    # stores into a 6-lane-wide padded scratch.
    x_nhwc = jnp.transpose(x_nchw, (0, 2, 3, 1)).astype(jnp.float32)
    x_pad = jnp.pad(x_nhwc, ((0, 0), (1, 1), (1, 1), (0, 0)))
    x_k = x_pad.reshape(B * (H + 2), (W + 2) * Cin)

    kernel = _make_fused_kernel(B, H, W, Cin)
    vmem = pl.BlockSpec(memory_space=pltpu.MemorySpace.VMEM)
    return pl.pallas_call(
        kernel,
        out_shape=jax.ShapeDtypeStruct((B, num_classes), jnp.float32),
        in_specs=[vmem] * 9,
        out_specs=vmem,
        scratch_shapes=[
            pltpu.VMEM((B * (H + 2) - 2, W * C1OUT), jnp.float32),       # conv1 out
            pltpu.VMEM((B * (H2 + 2), (W - 1) * C1OUT), jnp.float32),    # conv2 padded in
            pltpu.VMEM((B * (H2 + 2) - 2, W2 * C2OUT), jnp.float32),     # conv2 out
            pltpu.VMEM((B, H4 * W4 * C2OUT), jnp.float32),               # flattened pool2
        ],
    )(x_k, kp["w1"], kp["b1"], kp["w2"], kp["b2"],
      kp["w3"], kp["b3"], kp["w4"], kp["b4"])


# ------------------------- parameters / reference --------------------------

def init_raw_params(key, input_channels, num_classes=3):
    """Deterministic synthetic weights in PyTorch layouts."""
    ks = jax.random.split(key, 8)

    def he(k, shape, fan_in):
        return jax.random.normal(k, shape, jnp.float32) * jnp.sqrt(2.0 / fan_in)

    return {
        "conv1_w": he(ks[0], (C1OUT, input_channels, 3, 3), 9 * input_channels),
        "conv1_b": 0.01 * jax.random.normal(ks[1], (C1OUT,), jnp.float32),
        "conv2_w": he(ks[2], (C2OUT, C1OUT, 3, 3), 9 * C1OUT),
        "conv2_b": 0.01 * jax.random.normal(ks[3], (C2OUT,), jnp.float32),
        "fc1_w": he(ks[4], (FC1OUT, C2OUT * 15 * 1), C2OUT * 15 * 1),
        "fc1_b": 0.01 * jax.random.normal(ks[5], (FC1OUT,), jnp.float32),
        "fc2_w": he(ks[6], (num_classes, FC1OUT), FC1OUT),
        "fc2_b": 0.01 * jax.random.normal(ks[7], (num_classes,), jnp.float32),
    }


def prep_kernel_params(raw, H, W, input_channels):
    """One-time host-side repack of PyTorch-layout weights into kernel layouts."""
    Cin = input_channels
    W2 = W // 2
    H4, W4 = H // 4, W // 4

    # conv1: per-dy weights over the zero-padded row layout.
    #   lhs lanes: pw*Cin + ci (pw in [0, W+2)); rhs lanes: w_out*32 + co.
    w1 = jnp.zeros((3, (W + 2) * Cin, W * C1OUT), jnp.float32)
    for dy in range(3):
        for w_out in range(W):
            for dx in range(3):
                pw = w_out + dx
                blk = raw["conv1_w"][:, :, dy, dx].T                  # (Cin, 32)
                w1 = w1.at[dy, pw * Cin:(pw + 1) * Cin,
                           w_out * C1OUT:(w_out + 1) * C1OUT].set(blk)

    # conv2: per-dy weights over the pooled (uncompacted) layout.
    #   lhs lanes: w*32 + ci for w in [0, W-1); pooled w2=j at even w=2j,
    #   odd-w lanes get zero rows; W-padding is implicit (absent taps).
    w2 = jnp.zeros((3, (W - 1) * C1OUT, W2 * C2OUT), jnp.float32)
    for dy in range(3):
        for w2_out in range(W2):
            for dx in range(3):
                w2_in = w2_out + dx - 1
                if 0 <= w2_in < W2:
                    blk = raw["conv2_w"][:, :, dy, dx].T              # (32, 64)
                    w2 = w2.at[dy, (2 * w2_in) * C1OUT:(2 * w2_in + 1) * C1OUT,
                               w2_out * C2OUT:(w2_out + 1) * C2OUT].set(blk)

    # fc1 with PyTorch's NCHW flatten absorbed:
    #   w3[(h4*W4 + w4)*64 + c, o] = fc1_w[o, c*H4*W4 + h4*W4 + w4]
    fc1 = raw["fc1_w"].reshape(FC1OUT, C2OUT, H4, W4)
    w3 = jnp.transpose(fc1, (2, 3, 1, 0)).reshape(H4 * W4 * C2OUT, FC1OUT)

    return {
        "w1": w1,
        "b1": jnp.tile(raw["conv1_b"], W).reshape(1, W * C1OUT),
        "w2": w2,
        "b2": jnp.tile(raw["conv2_b"], W2).reshape(1, W2 * C2OUT),
        "w3": w3,
        "b3": raw["fc1_b"].reshape(1, FC1OUT),
        "w4": raw["fc2_w"].T,
        "b4": raw["fc2_b"].reshape(1, -1),
    }


def cnn_reference(x_nchw, raw):
    """Pure-JAX reference mirroring the PyTorch forward (sanity check)."""
    def conv(x, w, b):
        y = jax.lax.conv_general_dilated(
            x, w, window_strides=(1, 1), padding="SAME",
            dimension_numbers=("NCHW", "OIHW", "NCHW"))
        return y + b[None, :, None, None]

    def pool(x):
        return jax.lax.reduce_window(x, -jnp.inf, jax.lax.max,
                                     (1, 1, 2, 2), (1, 1, 2, 2), "VALID")

    y = pool(jax.nn.relu(conv(x_nchw, raw["conv1_w"], raw["conv1_b"])))
    y = pool(jax.nn.relu(conv(y, raw["conv2_w"], raw["conv2_b"])))
    y = y.reshape(y.shape[0], -1)
    y = jax.nn.relu(y @ raw["fc1_w"].T + raw["fc1_b"])
    return y @ raw["fc2_w"].T + raw["fc2_b"]


# ---------------------------------- main -----------------------------------

if __name__ == "__main__":
    key = jax.random.PRNGKey(0)
    k_x, k_p = jax.random.split(key)

    B, Cin, H, W = 2, 1, 60, 4          # 60x4 -> 30x2 -> 15x1 = 64*15*1 fc1 features
    num_classes = 3
    x = jax.random.normal(k_x, (B, Cin, H, W), jnp.float32)

    raw = init_raw_params(k_p, Cin, num_classes)
    kp = prep_kernel_params(raw, H, W, Cin)

    fwd = jax.jit(functools.partial(cnn_forward, kp=kp))
    out = jax.block_until_ready(fwd(x))
    assert out.shape == (B, num_classes)

    ref = jax.block_until_ready(cnn_reference(x, raw))
    # All-f32 path: tolerance tightened 20x vs. the previous 2e-2.
    if not jnp.allclose(out, ref, rtol=1e-3, atol=1e-3):
        max_err = jnp.max(jnp.abs(out - ref))
        raise AssertionError(f"Pallas CNN output mismatch (max abs err {max_err})")

    print("KERNEL_OK")
</pallas_src>

<mosaic_0001>
module attributes {stable_mosaic.version = 11 : i64} {
  func.func @kernel(%arg0: memref<124x6xf32, #tpu.memory_space<vmem>>, %arg1: memref<3x6x128xf32, #tpu.memory_space<vmem>>, %arg2: memref<1x128xf32, #tpu.memory_space<vmem>>, %arg3: memref<3x96x128xf32, #tpu.memory_space<vmem>>, %arg4: memref<1x128xf32, #tpu.memory_space<vmem>>, %arg5: memref<960x64xf32, #tpu.memory_space<vmem>>, %arg6: memref<1x64xf32, #tpu.memory_space<vmem>>, %arg7: memref<64x3xf32, #tpu.memory_space<vmem>>, %arg8: memref<1x3xf32, #tpu.memory_space<vmem>>, %arg9: memref<2x3xf32, #tpu.memory_space<vmem>>, %arg10: memref<122x128xf32, #tpu.memory_space<vmem>>, %arg11: memref<64x96xf32, #tpu.memory_space<vmem>>, %arg12: memref<62x128xf32, #tpu.memory_space<vmem>>, %arg13: memref<2x960xf32, #tpu.memory_space<vmem>>) attributes {dimension_semantics = [], scalar_prefetch = 0 : i64, scratch_operands = 4 : i64, tpu.core_type = #tpu.core_type<tc>} {
    %c0 = arith.constant 0 : index
    %c0_0 = arith.constant 0 : index
    %0 = vector.load %arg0[%c0, %c0_0] : memref<124x6xf32, #tpu.memory_space<vmem>>, vector<122x6xf32>
    %c0_1 = arith.constant 0 : index
    %c0_2 = arith.constant 0 : index
    %c0_3 = arith.constant 0 : index
    %1 = vector.load %arg1[%c0_1, %c0_2, %c0_3] : memref<3x6x128xf32, #tpu.memory_space<vmem>>, vector<1x6x128xf32>
    %2 = vector.shape_cast %1 : vector<1x6x128xf32> to vector<6x128xf32>
    %cst = arith.constant dense<0.000000e+00> : vector<122x128xf32>
    %3 = tpu.matmul %0, %2, %cst {dimension_numbers = #tpu.dot_dimension_numbers<[1], [0], [0], [1], [0, 0, 1, 1], [], []>} : vector<122x6xf32>, vector<6x128xf32>, vector<122x128xf32> -> vector<122x128xf32>
    %c1 = arith.constant 1 : index
    %c0_4 = arith.constant 0 : index
    %4 = vector.load %arg0[%c1, %c0_4] : memref<124x6xf32, #tpu.memory_space<vmem>>, vector<122x6xf32>
    %c1_5 = arith.constant 1 : index
    %c0_6 = arith.constant 0 : index
    %c0_7 = arith.constant 0 : index
    %5 = vector.load %arg1[%c1_5, %c0_6, %c0_7] : memref<3x6x128xf32, #tpu.memory_space<vmem>>, vector<1x6x128xf32>
    %6 = vector.shape_cast %5 : vector<1x6x128xf32> to vector<6x128xf32>
    %cst_8 = arith.constant dense<0.000000e+00> : vector<122x128xf32>
    %7 = tpu.matmul %4, %6, %cst_8 {dimension_numbers = #tpu.dot_dimension_numbers<[1], [0], [0], [1], [0, 0, 1, 1], [], []>} : vector<122x6xf32>, vector<6x128xf32>, vector<122x128xf32> -> vector<122x128xf32>
    %8 = arith.addf %3, %7 : vector<122x128xf32>
    %c2 = arith.constant 2 : index
    %c0_9 = arith.constant 0 : index
    %9 = vector.load %arg0[%c2, %c0_9] : memref<124x6xf32, #tpu.memory_space<vmem>>, vector<122x6xf32>
    %c2_10 = arith.constant 2 : index
    %c0_11 = arith.constant 0 : index
    %c0_12 = arith.constant 0 : index
    %10 = vector.load %arg1[%c2_10, %c0_11, %c0_12] : memref<3x6x128xf32, #tpu.memory_space<vmem>>, vector<1x6x128xf32>
    %11 = vector.shape_cast %10 : vector<1x6x128xf32> to vector<6x128xf32>
    %cst_13 = arith.constant dense<0.000000e+00> : vector<122x128xf32>
    %12 = tpu.matmul %9, %11, %cst_13 {dimension_numbers = #tpu.dot_dimension_numbers<[1], [0], [0], [1], [0, 0, 1, 1], [], []>} : vector<122x6xf32>, vector<6x128xf32>, vector<122x128xf32> -> vector<122x128xf32>
    %13 = arith.addf %8, %12 : vector<122x128xf32>
    %c0_14 = arith.constant 0 : index
    %c0_15 = arith.constant 0 : index
    %14 = vector.load %arg2[%c0_14, %c0_15] : memref<1x128xf32, #tpu.memory_space<vmem>>, vector<1x128xf32>
    %15 = vector.broadcast %14 : vector<1x128xf32> to vector<122x128xf32>
    %16 = arith.addf %13, %15 : vector<122x128xf32>
    %cst_16 = arith.constant 0.000000e+00 : f32
    %17 = vector.broadcast %cst_16 : f32 to vector<122x128xf32>
    %18 = arith.maximumf %16, %17 : vector<122x128xf32>
    %c0_17 = arith.constant 0 : index
    %c0_18 = arith.constant 0 : index
    %19 = vector.load %arg10[%c0_17, %c0_18] : memref<122x128xf32, #tpu.memory_space<vmem>>, vector<122x128xf32>
    tpu.vector_store %arg10[%c0_17, %c0_18], %18 {strides = array<i32>} : memref<122x128xf32, #tpu.memory_space<vmem>>, vector<122x128xf32>,
    %cst_19 = arith.constant 0.000000e+00 : f32
    %20 = vector.broadcast %cst_19 : f32 to vector<1x96xf32>
    %c0_20 = arith.constant 0 : index
    %c0_21 = arith.constant 0 : index
    %21 = vector.load %arg11[%c0_20, %c0_21] : memref<64x96xf32, #tpu.memory_space<vmem>>, vector<1x96xf32>
    tpu.vector_store %arg11[%c0_20, %c0_21], %20 {strides = array<i32>} : memref<64x96xf32, #tpu.memory_space<vmem>>, vector<1x96xf32>,
    %c31 = arith.constant 31 : index
    %c0_22 = arith.constant 0 : index
    %22 = vector.load %arg11[%c31, %c0_22] : memref<64x96xf32, #tpu.memory_space<vmem>>, vector<1x96xf32>
    tpu.vector_store %arg11[%c31, %c0_22], %20 {strides = array<i32>} : memref<64x96xf32, #tpu.memory_space<vmem>>, vector<1x96xf32>,
    %c0_23 = arith.constant 0 : index
    %c0_24 = arith.constant 0 : index
    %23 = tpu.strided_load %arg10[%c0_23, %c0_24] {strides = array<i32: 2, 1>} : memref<122x128xf32, #tpu.memory_space<vmem>>, vector<30x128xf32>
    %c1_25 = arith.constant 1 : index
    %c0_26 = arith.constant 0 : index
    %24 = tpu.strided_load %arg10[%c1_25, %c0_26] {strides = array<i32: 2, 1>} : memref<122x128xf32, #tpu.memory_space<vmem>>, vector<30x128xf32>
    %25 = arith.maximumf %23, %24 : vector<30x128xf32>
    %26 = vector.extract_strided_slice %25 {offsets = [0, 0], sizes = [30, 96], strides = [1, 1]} : vector<30x128xf32> to vector<30x96xf32>
    %27 = vector.extract_strided_slice %25 {offsets = [0, 32], sizes = [30, 96], strides = [1, 1]} : vector<30x128xf32> to vector<30x96xf32>
    %28 = arith.maximumf %26, %27 : vector<30x96xf32>
    %c1_27 = arith.constant 1 : index
    %c0_28 = arith.constant 0 : index
    %29 = vector.load %arg11[%c1_27, %c0_28] : memref<64x96xf32, #tpu.memory_space<vmem>>, vector<30x96xf32>
    tpu.vector_store %arg11[%c1_27, %c0_28], %28 {strides = array<i32>} : memref<64x96xf32, #tpu.memory_space<vmem>>, vector<30x96xf32>,
    %c32 = arith.constant 32 : index
    %c0_29 = arith.constant 0 : index
    %30 = vector.load %arg11[%c32, %c0_29] : memref<64x96xf32, #tpu.memory_space<vmem>>, vector<1x96xf32>
    tpu.vector_store %arg11[%c32, %c0_29], %20 {strides = array<i32>} : memref<64x96xf32, #tpu.memory_space<vmem>>, vector<1x96xf32>,
    %c63 = arith.constant 63 : index
    %c0_30 = arith.constant 0 : index
    %31 = vector.load %arg11[%c63, %c0_30] : memref<64x96xf32, #tpu.memory_space<vmem>>, vector<1x96xf32>
    tpu.vector_store %arg11[%c63, %c0_30], %20 {strides = array<i32>} : memref<64x96xf32, #tpu.memory_space<vmem>>, vector<1x96xf32>,
    %c62 = arith.constant 62 : index
    %c0_31 = arith.constant 0 : index
    %32 = tpu.strided_load %arg10[%c62, %c0_31] {strides = array<i32: 2, 1>} : memref<122x128xf32, #tpu.memory_space<vmem>>, vector<30x128xf32>
    %c63_32 = arith.constant 63 : index
    %c0_33 = arith.constant 0 : index
    %33 = tpu.strided_load %arg10[%c63_32, %c0_33] {strides = array<i32: 2, 1>} : memref<122x128xf32, #tpu.memory_space<vmem>>, vector<30x128xf32>
    %34 = arith.maximumf %32, %33 : vector<30x128xf32>
    %35 = vector.extract_strided_slice %34 {offsets = [0, 0], sizes = [30, 96], strides = [1, 1]} : vector<30x128xf32> to vector<30x96xf32>
    %36 = vector.extract_strided_slice %34 {offsets = [0, 32], sizes = [30, 96], strides = [1, 1]} : vector<30x128xf32> to vector<30x96xf32>
    %37 = arith.maximumf %35, %36 : vector<30x96xf32>
    %c33 = arith.constant 33 : index
    %c0_34 = arith.constant 0 : index
    %38 = vector.load %arg11[%c33, %c0_34] : memref<64x96xf32, #tpu.memory_space<vmem>>, vector<30x96xf32>
    tpu.vector_store %arg11[%c33, %c0_34], %37 {strides = array<i32>} : memref<64x96xf32, #tpu.memory_space<vmem>>, vector<30x96xf32>,
    %c0_35 = arith.constant 0 : index
    %c0_36 = arith.constant 0 : index
    %39 = vector.load %arg11[%c0_35, %c0_36] : memref<64x96xf32, #tpu.memory_space<vmem>>, vector<62x96xf32>
    %c0_37 = arith.constant 0 : index
    %c0_38 = arith.constant 0 : index
    %c0_39 = arith.constant 0 : index
    %40 = vector.load %arg3[%c0_37, %c0_38, %c0_39] : memref<3x96x128xf32, #tpu.memory_space<vmem>>, vector<1x96x128xf32>
    %41 = vector.shape_cast %40 : vector<1x96x128xf32> to vector<96x128xf32>
    %cst_40 = arith.constant dense<0.000000e+00> : vector<62x128xf32>
    %42 = tpu.matmul %39, %41, %cst_40 {dimension_numbers = #tpu.dot_dimension_numbers<[1], [0], [0], [1], [0, 0, 1, 1], [], []>} : vector<62x96xf32>, vector<96x128xf32>, vector<62x128xf32> -> vector<62x128xf32>
    %c1_41 = arith.constant 1 : index
    %c0_42 = arith.constant 0 : index
    %43 = vector.load %arg11[%c1_41, %c0_42] : memref<64x96xf32, #tpu.memory_space<vmem>>, vector<62x96xf32>
    %c1_43 = arith.constant 1 : index
    %c0_44 = arith.constant 0 : index
    %c0_45 = arith.constant 0 : index
    %44 = vector.load %arg3[%c1_43, %c0_44, %c0_45] : memref<3x96x128xf32, #tpu.memory_space<vmem>>, vector<1x96x128xf32>
    %45 = vector.shape_cast %44 : vector<1x96x128xf32> to vector<96x128xf32>
    %cst_46 = arith.constant dense<0.000000e+00> : vector<62x128xf32>
    %46 = tpu.matmul %43, %45, %cst_46 {dimension_numbers = #tpu.dot_dimension_numbers<[1], [0], [0], [1], [0, 0, 1, 1], [], []>} : vector<62x96xf32>, vector<96x128xf32>, vector<62x128xf32> -> vector<62x128xf32>
    %47 = arith.addf %42, %46 : vector<62x128xf32>
    %c2_47 = arith.constant 2 : index
    %c0_48 = arith.constant 0 : index
    %48 = vector.load %arg11[%c2_47, %c0_48] : memref<64x96xf32, #tpu.memory_space<vmem>>, vector<62x96xf32>
    %c2_49 = arith.constant 2 : index
    %c0_50 = arith.constant 0 : index
    %c0_51 = arith.constant 0 : index
    %49 = vector.load %arg3[%c2_49, %c0_50, %c0_51] : memref<3x96x128xf32, #tpu.memory_space<vmem>>, vector<1x96x128xf32>
    %50 = vector.shape_cast %49 : vector<1x96x128xf32> to vector<96x128xf32>
    %cst_52 = arith.constant dense<0.000000e+00> : vector<62x128xf32>
    %51 = tpu.matmul %48, %50, %cst_52 {dimension_numbers = #tpu.dot_dimension_numbers<[1], [0], [0], [1], [0, 0, 1, 1], [], []>} : vector<62x96xf32>, vector<96x128xf32>, vector<62x128xf32> -> vector<62x128xf32>
    %52 = arith.addf %47, %51 : vector<62x128xf32>
    %c0_53 = arith.constant 0 : index
    %c0_54 = arith.constant 0 : index
    %53 = vector.load %arg4[%c0_53, %c0_54] : memref<1x128xf32, #tpu.memory_space<vmem>>, vector<1x128xf32>
    %54 = vector.broadcast %53 : vector<1x128xf32> to vector<62x128xf32>
    %55 = arith.addf %52, %54 : vector<62x128xf32>
    %cst_55 = arith.constant 0.000000e+00 : f32
    %56 = vector.broadcast %cst_55 : f32 to vector<62x128xf32>
    %57 = arith.maximumf %55, %56 : vector<62x128xf32>
    %c0_56 = arith.constant 0 : index
    %c0_57 = arith.constant 0 : index
    %58 = vector.load %arg12[%c0_56, %c0_57] : memref<62x128xf32, #tpu.memory_space<vmem>>, vector<62x128xf32>
    tpu.vector_store %arg12[%c0_56, %c0_57], %57 {strides = array<i32>} : memref<62x128xf32, #tpu.memory_space<vmem>>, vector<62x128xf32>,
    %c0_58 = arith.constant 0 : index
    %c0_59 = arith.constant 0 : index
    %59 = tpu.strided_load %arg12[%c0_58, %c0_59] {strides = array<i32: 2, 1>} : memref<62x128xf32, #tpu.memory_space<vmem>>, vector<15x128xf32>
    %c1_60 = arith.constant 1 : index
    %c0_61 = arith.constant 0 : index
    %60 = tpu.strided_load %arg12[%c1_60, %c0_61] {strides = array<i32: 2, 1>} : memref<62x128xf32, #tpu.memory_space<vmem>>, vector<15x128xf32>
    %61 = arith.maximumf %59, %60 : vector<15x128xf32>
    %62 = vector.extract_strided_slice %61 {offsets = [0, 0], sizes = [15, 64], strides = [1, 1]} : vector<15x128xf32> to vector<15x64xf32>
    %63 = vector.extract_strided_slice %61 {offsets = [0, 64], sizes = [15, 64], strides = [1, 1]} : vector<15x128xf32> to vector<15x64xf32>
    %64 = arith.maximumf %62, %63 : vector<15x64xf32>
    %65 = vector.extract_strided_slice %64 {offsets = [0, 0], sizes = [1, 64], strides = [1, 1]} : vector<15x64xf32> to vector<1x64xf32>
    %c0_62 = arith.constant 0 : index
    %c0_63 = arith.constant 0 : index
    %66 = vector.load %arg13[%c0_62, %c0_63] : memref<2x960xf32, #tpu.memory_space<vmem>>, vector<1x64xf32>
    tpu.vector_store %arg13[%c0_62, %c0_63], %65 {strides = array<i32>} : memref<2x960xf32, #tpu.memory_space<vmem>>, vector<1x64xf32>,
    %67 = vector.extract_strided_slice %64 {offsets = [1, 0], sizes = [1, 64], strides = [1, 1]} : vector<15x64xf32> to vector<1x64xf32>
    %c0_64 = arith.constant 0 : index
    %c64 = arith.constant 64 : index
    %68 = vector.load %arg13[%c0_64, %c64] : memref<2x960xf32, #tpu.memory_space<vmem>>, vector<1x64xf32>
    tpu.vector_store %arg13[%c0_64, %c64], %67 {strides = array<i32>} : memref<2x960xf32, #tpu.memory_space<vmem>>, vector<1x64xf32>,
    %69 = vector.extract_strided_slice %64 {offsets = [2, 0], sizes = [1, 64], strides = [1, 1]} : vector<15x64xf32> to vector<1x64xf32>
    %c0_65 = arith.constant 0 : index
    %c128 = arith.constant 128 : index
    %70 = vector.load %arg13[%c0_65, %c128] : memref<2x960xf32, #tpu.memory_space<vmem>>, vector<1x64xf32>
    tpu.vector_store %arg13[%c0_65, %c128], %69 {strides = array<i32>} : memref<2x960xf32, #tpu.memory_space<vmem>>, vector<1x64xf32>,
    %71 = vector.extract_strided_slice %64 {offsets = [3, 0], sizes = [1, 64], strides = [1, 1]} : vector<15x64xf32> to vector<1x64xf32>
    %c0_66 = arith.constant 0 : index
    %c192 = arith.constant 192 : index
    %72 = vector.load %arg13[%c0_66, %c192] : memref<2x960xf32, #tpu.memory_space<vmem>>, vector<1x64xf32>
    tpu.vector_store %arg13[%c0_66, %c192], %71 {strides = array<i32>} : memref<2x960xf32, #tpu.memory_space<vmem>>, vector<1x64xf32>,
    %73 = vector.extract_strided_slice %64 {offsets = [4, 0], sizes = [1, 64], strides = [1, 1]} : vector<15x64xf32> to vector<1x64xf32>
    %c0_67 = arith.constant 0 : index
    %c256 = arith.constant 256 : index
    %74 = vector.load %arg13[%c0_67, %c256] : memref<2x960xf32, #tpu.memory_space<vmem>>, vector<1x64xf32>
    tpu.vector_store %arg13[%c0_67, %c256], %73 {strides = array<i32>} : memref<2x960xf32, #tpu.memory_space<vmem>>, vector<1x64xf32>,
    %75 = vector.extract_strided_slice %64 {offsets = [5, 0], sizes = [1, 64], strides = [1, 1]} : vector<15x64xf32> to vector<1x64xf32>
    %c0_68 = arith.constant 0 : index
    %c320 = arith.constant 320 : index
    %76 = vector.load %arg13[%c0_68, %c320] : memref<2x960xf32, #tpu.memory_space<vmem>>, vector<1x64xf32>
    tpu.vector_store %arg13[%c0_68, %c320], %75 {strides = array<i32>} : memref<2x960xf32, #tpu.memory_space<vmem>>, vector<1x64xf32>,
    %77 = vector.extract_strided_slice %64 {offsets = [6, 0], sizes = [1, 64], strides = [1, 1]} : vector<15x64xf32> to vector<1x64xf32>
    %c0_69 = arith.constant 0 : index
    %c384 = arith.constant 384 : index
    %78 = vector.load %arg13[%c0_69, %c384] : memref<2x960xf32, #tpu.memory_space<vmem>>, vector<1x64xf32>
    tpu.vector_store %arg13[%c0_69, %c384], %77 {strides = array<i32>} : memref<2x960xf32, #tpu.memory_space<vmem>>, vector<1x64xf32>,
    %79 = vector.extract_strided_slice %64 {offsets = [7, 0], sizes = [1, 64], strides = [1, 1]} : vector<15x64xf32> to vector<1x64xf32>
    %c0_70 = arith.constant 0 : index
    %c448 = arith.constant 448 : index
    %80 = vector.load %arg13[%c0_70, %c448] : memref<2x960xf32, #tpu.memory_space<vmem>>, vector<1x64xf32>
    tpu.vector_store %arg13[%c0_70, %c448], %79 {strides = array<i32>} : memref<2x960xf32, #tpu.memory_space<vmem>>, vector<1x64xf32>,
    %81 = vector.extract_strided_slice %64 {offsets = [8, 0], sizes = [1, 64], strides = [1, 1]} : vector<15x64xf32> to vector<1x64xf32>
    %c0_71 = arith.constant 0 : index
    %c512 = arith.constant 512 : index
    %82 = vector.load %arg13[%c0_71, %c512] : memref<2x960xf32, #tpu.memory_space<vmem>>, vector<1x64xf32>
    tpu.vector_store %arg13[%c0_71, %c512], %81 {strides = array<i32>} : memref<2x960xf32, #tpu.memory_space<vmem>>, vector<1x64xf32>,
    %83 = vector.extract_strided_slice %64 {offsets = [9, 0], sizes = [1, 64], strides = [1, 1]} : vector<15x64xf32> to vector<1x64xf32>
    %c0_72 = arith.constant 0 : index
    %c576 = arith.constant 576 : index
    %84 = vector.load %arg13[%c0_72, %c576] : memref<2x960xf32, #tpu.memory_space<vmem>>, vector<1x64xf32>
    tpu.vector_store %arg13[%c0_72, %c576], %83 {strides = array<i32>} : memref<2x960xf32, #tpu.memory_space<vmem>>, vector<1x64xf32>,
    %85 = vector.extract_strided_slice %64 {offsets = [10, 0], sizes = [1, 64], strides = [1, 1]} : vector<15x64xf32> to vector<1x64xf32>
    %c0_73 = arith.constant 0 : index
    %c640 = arith.constant 640 : index
    %86 = vector.load %arg13[%c0_73, %c640] : memref<2x960xf32, #tpu.memory_space<vmem>>, vector<1x64xf32>
    tpu.vector_store %arg13[%c0_73, %c640], %85 {strides = array<i32>} : memref<2x960xf32, #tpu.memory_space<vmem>>, vector<1x64xf32>,
    %87 = vector.extract_strided_slice %64 {offsets = [11, 0], sizes = [1, 64], strides = [1, 1]} : vector<15x64xf32> to vector<1x64xf32>
    %c0_74 = arith.constant 0 : index
    %c704 = arith.constant 704 : index
    %88 = vector.load %arg13[%c0_74, %c704] : memref<2x960xf32, #tpu.memory_space<vmem>>, vector<1x64xf32>
    tpu.vector_store %arg13[%c0_74, %c704], %87 {strides = array<i32>} : memref<2x960xf32, #tpu.memory_space<vmem>>, vector<1x64xf32>,
    %89 = vector.extract_strided_slice %64 {offsets = [12, 0], sizes = [1, 64], strides = [1, 1]} : vector<15x64xf32> to vector<1x64xf32>
    %c0_75 = arith.constant 0 : index
    %c768 = arith.constant 768 : index
    %90 = vector.load %arg13[%c0_75, %c768] : memref<2x960xf32, #tpu.memory_space<vmem>>, vector<1x64xf32>
    tpu.vector_store %arg13[%c0_75, %c768], %89 {strides = array<i32>} : memref<2x960xf32, #tpu.memory_space<vmem>>, vector<1x64xf32>,
    %91 = vector.extract_strided_slice %64 {offsets = [13, 0], sizes = [1, 64], strides = [1, 1]} : vector<15x64xf32> to vector<1x64xf32>
    %c0_76 = arith.constant 0 : index
    %c832 = arith.constant 832 : index
    %92 = vector.load %arg13[%c0_76, %c832] : memref<2x960xf32, #tpu.memory_space<vmem>>, vector<1x64xf32>
    tpu.vector_store %arg13[%c0_76, %c832], %91 {strides = array<i32>} : memref<2x960xf32, #tpu.memory_space<vmem>>, vector<1x64xf32>,
    %93 = vector.extract_strided_slice %64 {offsets = [14, 0], sizes = [1, 64], strides = [1, 1]} : vector<15x64xf32> to vector<1x64xf32>
    %c0_77 = arith.constant 0 : index
    %c896 = arith.constant 896 : index
    %94 = vector.load %arg13[%c0_77, %c896] : memref<2x960xf32, #tpu.memory_space<vmem>>, vector<1x64xf32>
    tpu.vector_store %arg13[%c0_77, %c896], %93 {strides = array<i32>} : memref<2x960xf32, #tpu.memory_space<vmem>>, vector<1x64xf32>,
    %c32_78 = arith.constant 32 : index
    %c0_79 = arith.constant 0 : index
    %95 = tpu.strided_load %arg12[%c32_78, %c0_79] {strides = array<i32: 2, 1>} : memref<62x128xf32, #tpu.memory_space<vmem>>, vector<15x128xf32>
    %c33_80 = arith.constant 33 : index
    %c0_81 = arith.constant 0 : index
    %96 = tpu.strided_load %arg12[%c33_80, %c0_81] {strides = array<i32: 2, 1>} : memref<62x128xf32, #tpu.memory_space<vmem>>, vector<15x128xf32>
    %97 = arith.maximumf %95, %96 : vector<15x128xf32>
    %98 = vector.extract_strided_slice %97 {offsets = [0, 0], sizes = [15, 64], strides = [1, 1]} : vector<15x128xf32> to vector<15x64xf32>
    %99 = vector.extract_strided_slice %97 {offsets = [0, 64], sizes = [15, 64], strides = [1, 1]} : vector<15x128xf32> to vector<15x64xf32>
    %100 = arith.maximumf %98, %99 : vector<15x64xf32>
    %101 = vector.extract_strided_slice %100 {offsets = [0, 0], sizes = [1, 64], strides = [1, 1]} : vector<15x64xf32> to vector<1x64xf32>
    %c1_82 = arith.constant 1 : index
    %c0_83 = arith.constant 0 : index
    %102 = vector.load %arg13[%c1_82, %c0_83] : memref<2x960xf32, #tpu.memory_space<vmem>>, vector<1x64xf32>
    tpu.vector_store %arg13[%c1_82, %c0_83], %101 {strides = array<i32>} : memref<2x960xf32, #tpu.memory_space<vmem>>, vector<1x64xf32>,
    %103 = vector.extract_strided_slice %100 {offsets = [1, 0], sizes = [1, 64], strides = [1, 1]} : vector<15x64xf32> to vector<1x64xf32>
    %c1_84 = arith.constant 1 : index
    %c64_85 = arith.constant 64 : index
    %104 = vector.load %arg13[%c1_84, %c64_85] : memref<2x960xf32, #tpu.memory_space<vmem>>, vector<1x64xf32>
    tpu.vector_store %arg13[%c1_84, %c64_85], %103 {strides = array<i32>} : memref<2x960xf32, #tpu.memory_space<vmem>>, vector<1x64xf32>,
    %105 = vector.extract_strided_slice %100 {offsets = [2, 0], sizes = [1, 64], strides = [1, 1]} : vector<15x64xf32> to vector<1x64xf32>
    %c1_86 = arith.constant 1 : index
    %c128_87 = arith.constant 128 : index
    %106 = vector.load %arg13[%c1_86, %c128_87] : memref<2x960xf32, #tpu.memory_space<vmem>>, vector<1x64xf32>
    tpu.vector_store %arg13[%c1_86, %c128_87], %105 {strides = array<i32>} : memref<2x960xf32, #tpu.memory_space<vmem>>, vector<1x64xf32>,
    %107 = vector.extract_strided_slice %100 {offsets = [3, 0], sizes = [1, 64], strides = [1, 1]} : vector<15x64xf32> to vector<1x64xf32>
    %c1_88 = arith.constant 1 : index
    %c192_89 = arith.constant 192 : index
    %108 = vector.load %arg13[%c1_88, %c192_89] : memref<2x960xf32, #tpu.memory_space<vmem>>, vector<1x64xf32>
    tpu.vector_store %arg13[%c1_88, %c192_89], %107 {strides = array<i32>} : memref<2x960xf32, #tpu.memory_space<vmem>>, vector<1x64xf32>,
    %109 = vector.extract_strided_slice %100 {offsets = [4, 0], sizes = [1, 64], strides = [1, 1]} : vector<15x64xf32> to vector<1x64xf32>
    %c1_90 = arith.constant 1 : index
    %c256_91 = arith.constant 256 : index
    %110 = vector.load %arg13[%c1_90, %c256_91] : memref<2x960xf32, #tpu.memory_space<vmem>>, vector<1x64xf32>
    tpu.vector_store %arg13[%c1_90, %c256_91], %109 {strides = array<i32>} : memref<2x960xf32, #tpu.memory_space<vmem>>, vector<1x64xf32>,
    %111 = vector.extract_strided_slice %100 {offsets = [5, 0], sizes = [1, 64], strides = [1, 1]} : vector<15x64xf32> to vector<1x64xf32>
    %c1_92 = arith.constant 1 : index
    %c320_93 = arith.constant 320 : index
    %112 = vector.load %arg13[%c1_92, %c320_93] : memref<2x960xf32, #tpu.memory_space<vmem>>, vector<1x64xf32>
    tpu.vector_store %arg13[%c1_92, %c320_93], %111 {strides = array<i32>} : memref<2x960xf32, #tpu.memory_space<vmem>>, vector<1x64xf32>,
    %113 = vector.extract_strided_slice %100 {offsets = [6, 0], sizes = [1, 64], strides = [1, 1]} : vector<15x64xf32> to vector<1x64xf32>
    %c1_94 = arith.constant 1 : index
    %c384_95 = arith.constant 384 : index
    %114 = vector.load %arg13[%c1_94, %c384_95] : memref<2x960xf32, #tpu.memory_space<vmem>>, vector<1x64xf32>
    tpu.vector_store %arg13[%c1_94, %c384_95], %113 {strides = array<i32>} : memref<2x960xf32, #tpu.memory_space<vmem>>, vector<1x64xf32>,
    %115 = vector.extract_strided_slice %100 {offsets = [7, 0], sizes = [1, 64], strides = [1, 1]} : vector<15x64xf32> to vector<1x64xf32>
    %c1_96 = arith.constant 1 : index
    %c448_97 = arith.constant 448 : index
    %116 = vector.load %arg13[%c1_96, %c448_97] : memref<2x960xf32, #tpu.memory_space<vmem>>, vector<1x64xf32>
    tpu.vector_store %arg13[%c1_96, %c448_97], %115 {strides = array<i32>} : memref<2x960xf32, #tpu.memory_space<vmem>>, vector<1x64xf32>,
    %117 = vector.extract_strided_slice %100 {offsets = [8, 0], sizes = [1, 64], strides = [1, 1]} : vector<15x64xf32> to vector<1x64xf32>
    %c1_98 = arith.constant 1 : index
    %c512_99 = arith.constant 512 : index
    %118 = vector.load %arg13[%c1_98, %c512_99] : memref<2x960xf32, #tpu.memory_space<vmem>>, vector<1x64xf32>
    tpu.vector_store %arg13[%c1_98, %c512_99], %117 {strides = array<i32>} : memref<2x960xf32, #tpu.memory_space<vmem>>, vector<1x64xf32>,
    %119 = vector.extract_strided_slice %100 {offsets = [9, 0], sizes = [1, 64], strides = [1, 1]} : vector<15x64xf32> to vector<1x64xf32>
    %c1_100 = arith.constant 1 : index
    %c576_101 = arith.constant 576 : index
    %120 = vector.load %arg13[%c1_100, %c576_101] : memref<2x960xf32, #tpu.memory_space<vmem>>, vector<1x64xf32>
    tpu.vector_store %arg13[%c1_100, %c576_101], %119 {strides = array<i32>} : memref<2x960xf32, #tpu.memory_space<vmem>>, vector<1x64xf32>,
    %121 = vector.extract_strided_slice %100 {offsets = [10, 0], sizes = [1, 64], strides = [1, 1]} : vector<15x64xf32> to vector<1x64xf32>
    %c1_102 = arith.constant 1 : index
    %c640_103 = arith.constant 640 : index
    %122 = vector.load %arg13[%c1_102, %c640_103] : memref<2x960xf32, #tpu.memory_space<vmem>>, vector<1x64xf32>
    tpu.vector_store %arg13[%c1_102, %c640_103], %121 {strides = array<i32>} : memref<2x960xf32, #tpu.memory_space<vmem>>, vector<1x64xf32>,
    %123 = vector.extract_strided_slice %100 {offsets = [11, 0], sizes = [1, 64], strides = [1, 1]} : vector<15x64xf32> to vector<1x64xf32>
    %c1_104 = arith.constant 1 : index
    %c704_105 = arith.constant 704 : index
    %124 = vector.load %arg13[%c1_104, %c704_105] : memref<2x960xf32, #tpu.memory_space<vmem>>, vector<1x64xf32>
    tpu.vector_store %arg13[%c1_104, %c704_105], %123 {strides = array<i32>} : memref<2x960xf32, #tpu.memory_space<vmem>>, vector<1x64xf32>,
    %125 = vector.extract_strided_slice %100 {offsets = [12, 0], sizes = [1, 64], strides = [1, 1]} : vector<15x64xf32> to vector<1x64xf32>
    %c1_106 = arith.constant 1 : index
    %c768_107 = arith.constant 768 : index
    %126 = vector.load %arg13[%c1_106, %c768_107] : memref<2x960xf32, #tpu.memory_space<vmem>>, vector<1x64xf32>
    tpu.vector_store %arg13[%c1_106, %c768_107], %125 {strides = array<i32>} : memref<2x960xf32, #tpu.memory_space<vmem>>, vector<1x64xf32>,
    %127 = vector.extract_strided_slice %100 {offsets = [13, 0], sizes = [1, 64], strides = [1, 1]} : vector<15x64xf32> to vector<1x64xf32>
    %c1_108 = arith.constant 1 : index
    %c832_109 = arith.constant 832 : index
    %128 = vector.load %arg13[%c1_108, %c832_109] : memref<2x960xf32, #tpu.memory_space<vmem>>, vector<1x64xf32>
    tpu.vector_store %arg13[%c1_108, %c832_109], %127 {strides = array<i32>} : memref<2x960xf32, #tpu.memory_space<vmem>>, vector<1x64xf32>,
    %129 = vector.extract_strided_slice %100 {offsets = [14, 0], sizes = [1, 64], strides = [1, 1]} : vector<15x64xf32> to vector<1x64xf32>
    %c1_110 = arith.constant 1 : index
    %c896_111 = arith.constant 896 : index
    %130 = vector.load %arg13[%c1_110, %c896_111] : memref<2x960xf32, #tpu.memory_space<vmem>>, vector<1x64xf32>
    tpu.vector_store %arg13[%c1_110, %c896_111], %129 {strides = array<i32>} : memref<2x960xf32, #tpu.memory_space<vmem>>, vector<1x64xf32>,
    %c0_112 = arith.constant 0 : index
    %c0_113 = arith.constant 0 : index
    %131 = vector.load %arg13[%c0_112, %c0_113] : memref<2x960xf32, #tpu.memory_space<vmem>>, vector<2x960xf32>
    %c0_114 = arith.constant 0 : index
    %c0_115 = arith.constant 0 : index
    %132 = vector.load %arg5[%c0_114, %c0_115] : memref<960x64xf32, #tpu.memory_space<vmem>>, vector<960x64xf32>
    %cst_116 = arith.constant dense<0.000000e+00> : vector<2x64xf32>
    %133 = tpu.matmul %131, %132, %cst_116 {dimension_numbers = #tpu.dot_dimension_numbers<[1], [0], [0], [1], [0, 0, 1, 1], [], []>} : vector<2x960xf32>, vector<960x64xf32>, vector<2x64xf32> -> vector<2x64xf32>
    %c0_117 = arith.constant 0 : index
    %c0_118 = arith.constant 0 : index
    %134 = vector.load %arg6[%c0_117, %c0_118] : memref<1x64xf32, #tpu.memory_space<vmem>>, vector<1x64xf32>
    %135 = vector.broadcast %134 : vector<1x64xf32> to vector<2x64xf32>
    %136 = arith.addf %133, %135 : vector<2x64xf32>
    %cst_119 = arith.constant 0.000000e+00 : f32
    %137 = vector.broadcast %cst_119 : f32 to vector<2x64xf32>
    %138 = arith.maximumf %136, %137 : vector<2x64xf32>
    %c0_120 = arith.constant 0 : index
    %c0_121 = arith.constant 0 : index
    %139 = vector.load %arg7[%c0_120, %c0_121] : memref<64x3xf32, #tpu.memory_space<vmem>>, vector<64x3xf32>
    %cst_122 = arith.constant dense<0.000000e+00> : vector<2x3xf32>
    %140 = tpu.matmul %138, %139, %cst_122 {dimension_numbers = #tpu.dot_dimension_numbers<[1], [0], [0], [1], [0, 0, 1, 1], [], []>} : vector<2x64xf32>, vector<64x3xf32>, vector<2x3xf32> -> vector<2x3xf32>
    %c0_123 = arith.constant 0 : index
    %c0_124 = arith.constant 0 : index
    %141 = vector.load %arg8[%c0_123, %c0_124] : memref<1x3xf32, #tpu.memory_space<vmem>>, vector<1x3xf32>
    %142 = vector.broadcast %141 : vector<1x3xf32> to vector<2x3xf32>
    %143 = arith.addf %140, %142 : vector<2x3xf32>
    %c0_125 = arith.constant 0 : index
    %c0_126 = arith.constant 0 : index
    %144 = vector.load %arg9[%c0_125, %c0_126] : memref<2x3xf32, #tpu.memory_space<vmem>>, vector<2x3xf32>
    tpu.vector_store %arg9[%c0_125, %c0_126], %143 {strides = array<i32>} : memref<2x3xf32, #tpu.memory_space<vmem>>, vector<2x3xf32>,
    return
  }
}

</mosaic_0001>

<bundles_post_ra>
// kernel: cnn_forward.1
= control target key start
LH: loop header
LB: loop body
LE: loop exit
PB: predicated region body
PF: predicated region fallthrough
CT: control target
= control target key end

     0   :  { %14 = vsyncpa [#allocation7], 0  ;;  %s2168_s0 = inlined_call_operand.vmem [shape: f32[124,6], index: 0, kind: input, shape index: {}]   ;;  %s2169_s1 = inlined_call_operand.vmem [shape: f32[3,6,128], index: 1, kind: input, shape index: {}]   ;;  %s2170_s2 = inlined_call_operand.vmem [shape: f32[1,128], index: 2, kind: input, shape index: {}]   ;;  %s2171_s3 = inlined_call_operand.hbm [shape: f32[3,96,128], index: 3, kind: input, shape index: {}]   ;;  %s2172_s4 = inlined_call_operand.vmem [shape: f32[1,128], index: 4, kind: input, shape index: {}]   ;;  %s2173_s5 = inlined_call_operand.hbm [shape: f32[960,64], index: 5, kind: input, shape index: {}]   ;;  %s2174_s6 = inlined_call_operand.vmem [shape: f32[1,64], index: 6, kind: input, shape index: {}]   ;;  %s2175_s7 = inlined_call_operand.vmem [shape: f32[64,3], index: 7, kind: input, shape index: {}]   ;;  %s2176_s8 = inlined_call_operand.vmem [shape: f32[1,3], index: 8, kind: input, shape index: {}]   ;;  %s2177_s9 = inlined_call_operand.hbm [shape: f32[2,3], index: 9, kind: output, shape index: {}]  }
   0x1   :  { %15 = vsyncpa [#allocation10], 0 }
   0x2   :  { %16 = vsyncpa [#allocation8], 0  ;;  %s27_s11 = sshll.u32 %s2171_s3, 4  ;;  %s1695_s12 = smov [#allocation6]   ;;  %s28_s11 = int_to_ptr.hbm [resolvable:$true] %s27_s11 }
   0x3   :  { %s29_s13 = sshll.u32 %s1695_s12, 4  ;;  %s42_s16 = sshll.u32 %s2173_s5, 4  ;;  %s30_s13 = int_to_ptr.vmem [resolvable:$true] %s29_s13  ;;  %s43_s16 = int_to_ptr.hbm [resolvable:$true] %s42_s16 }
   0x4   :  { %s1696_s17 = smov 128   ;;  %s1697_s18 = smov 8  }
   0x5   :  { %35 = dma.hbm_to_vmem [thread:$0]  %s28_s11, 4608, %s30_s13, [#allocation7], %s1696_s17, %s1696_s17, %s1697_s18  }
   0x6   :  { %s1698_s19 = smov [#allocation9]  }
   0x7   :  { %s44_s20 = sshll.u32 %s1698_s19, 4  ;;  %s45_s20 = int_to_ptr.vmem [resolvable:$true] %s44_s20 }
   0x8   :  { %50 = dma.hbm_to_vmem [thread:$0]  %s43_s16, 15360, %s45_s20, [#allocation10], %s1696_s17, %s1696_s17, %s1697_s18  }
   0x9   :  { %1689 = dma.done.wait [#allocation7], 4608  }
   0xa   :  { %1690 = vsyncadd [#allocation7], 4294962688 }
   0xb   :  { %1691 = dma.done.wait [#allocation10], 15360  }
   0xc   :  { %1692 = vsyncadd [#allocation10], 4294951936  ;;  %vm149_vm0 = vcmask 1045504   ;;  %vm100_vm1 = vcmask 48128   ;;  %v1511_v0 = vld [vmem:[%s2169_s1 + $0x8] sm:$0x3f] }
   0xd   :  { %v97_v1 = vld [vmem:[%s2168_s0 + $0x79] sm:$0x3]  ;;  %v81_v2 = vld [vmem:[%s2169_s1] sm:$0x3f]  ;;  %1604 = vmatpush.msk.msra.mxu1 %vm149_vm0, %v1511_v0  ;;  %v1546_v3 = vld [vmem:[%s2169_s1 + $0x10] sm:$0x3f]  ;;  %1512 = vmatpush.msk.msra.mxu0 %vm149_vm0, %v1511_v0 }
   0xe   :  { %v334_v4 = vld [vmem:[%s2168_s0 + $0x2] sm:$0xff]  ;;  %1528 = vmatmul.msk.f32.vlgmr.msra.gmra.mxu1 %vm100_vm1, %v97_v1  ;;  %1547 = vmatpush.msk.msra.mxu2 %vm149_vm0, %v1546_v3  ;;  %v335_v7 = vld [vmem:[%s2168_s0 + $0xa] sm:$0xff]  ;;  %v336_v10 = vld [vmem:[%s2168_s0 + $0x12] sm:$0xff]  ;;  %vm536_vm2 = vcmask 778240   ;;  %vm578_vm3 = vcmask 785408   ;;  %vm582_vm4 = vcmask 783360  }
   0xf   :  { %v82_v5 = vld [vmem:[%s2168_s0 + $0x1] sm:$0xff]  ;;  %1529 = vmatpush.msk.msrb.mxu1 %vm149_vm0, %v81_v2  ;;  %1548 = vmatmul.msk.f32.vlgmr.msra.gmra.mxu2 %vm100_vm1, %v334_v4  ;;  %v83_v8 = vld [vmem:[%s2168_s0 + $0x9] sm:$0xff]  ;;  %v84_v11 = vld [vmem:[%s2168_s0 + $0x11] sm:$0xff]  ;;  %vm942_vm5 = vcmask 516096   ;;  %vm950_vm6 = vcmask 1040896   ;;  %vm1292_vm7 = vcmask 523264  }
  0x10   :  { %1513 = vmatmul.msk.f32.vlgmr.msra.gmra.mxu0 %vm100_vm1, %v82_v5  ;;  %v65_v6 = vld [vmem:[%s2168_s0] sm:$0xff]  ;;  %v66_v9 = vld [vmem:[%s2168_s0 + $0x8] sm:$0xff]  ;;  %v67_v12 = vld [vmem:[%s2168_s0 + $0x10] sm:$0xff]  ;;  %s1702_s5 = smov [#allocation11]   ;;  %s1500_s26 = sshll.u32 %s2177_s9, 4  ;;  %vm1491_vm8 = vcmask 17408   ;;  %s1501_s26 = int_to_ptr.hbm [resolvable:$true] %s1500_s26 }
  0x11   :  { %v337_v13 = vld [vmem:[%s2168_s0 + $0x1a] sm:$0xff]  ;;  %v338_v16 = vld [vmem:[%s2168_s0 + $0x22] sm:$0xff]  ;;  %v339_v19 = vld [vmem:[%s2168_s0 + $0x2a] sm:$0xff]  ;;  %s1498_s23 = sshll.u32 %s1702_s5, 4  ;;  %s1499_s23 = int_to_ptr.vmem [resolvable:$true] %s1498_s23 }
  0x12   :  { %v85_v14 = vld [vmem:[%s2168_s0 + $0x19] sm:$0xff]  ;;  %v86_v17 = vld [vmem:[%s2168_s0 + $0x21] sm:$0xff]  ;;  %v87_v20 = vld [vmem:[%s2168_s0 + $0x29] sm:$0xff] }
  0x13   :  { %v68_v15 = vld [vmem:[%s2168_s0 + $0x18] sm:$0xff]  ;;  %v69_v18 = vld [vmem:[%s2168_s0 + $0x20] sm:$0xff]  ;;  %v70_v21 = vld [vmem:[%s2168_s0 + $0x28] sm:$0xff] }
  0x14   :  { %v340_v22 = vld [vmem:[%s2168_s0 + $0x32] sm:$0xff]  ;;  %v341_v25 = vld [vmem:[%s2168_s0 + $0x3a] sm:$0xff]  ;;  %v342_v28 = vld [vmem:[%s2168_s0 + $0x42] sm:$0xff] }
  0x15   :  { %v88_v23 = vld [vmem:[%s2168_s0 + $0x31] sm:$0xff]  ;;  %v89_v26 = vld [vmem:[%s2168_s0 + $0x39] sm:$0xff]  ;;  %v90_v29 = vld [vmem:[%s2168_s0 + $0x41] sm:$0xff] }
  0x16   :  { %1530 = vmatmul.msk.f32.vlgmr.msrb.gmra.mxu1 %vm100_vm1, %v65_v6  ;;  %v71_v24 = vld [vmem:[%s2168_s0 + $0x30] sm:$0xff]  ;;  %v72_v27 = vld [vmem:[%s2168_s0 + $0x38] sm:$0xff]  ;;  %v73_v30 = vld [vmem:[%s2168_s0 + $0x40] sm:$0xff] }
  0x17   :  { %1549 = vmatmul.msk.f32.gmra.mxu2 %vm100_vm1, %v335_v7  ;;  %v343_v31 = vld [vmem:[%s2168_s0 + $0x4a] sm:$0xff]  ;;  %v344_v34 = vld [vmem:[%s2168_s0 + $0x52] sm:$0xff]  ;;  %v345_v37 = vld [vmem:[%s2168_s0 + $0x5a] sm:$0xff] }
  0x18   :  { %1514 = vmatmul.msk.f32.gmra.mxu0 %vm100_vm1, %v83_v8  ;;  %v91_v32 = vld [vmem:[%s2168_s0 + $0x49] sm:$0xff]  ;;  %v92_v35 = vld [vmem:[%s2168_s0 + $0x51] sm:$0xff]  ;;  %v93_v38 = vld [vmem:[%s2168_s0 + $0x59] sm:$0xff] }
  0x19   :  { %v74_v33 = vld [vmem:[%s2168_s0 + $0x48] sm:$0xff]  ;;  %v75_v36 = vld [vmem:[%s2168_s0 + $0x50] sm:$0xff]  ;;  %v76_v39 = vld [vmem:[%s2168_s0 + $0x58] sm:$0xff] }
  0x1a   :  { %v346_v40 = vld [vmem:[%s2168_s0 + $0x62] sm:$0xff]  ;;  %v347_v43 = vld [vmem:[%s2168_s0 + $0x6a] sm:$0xff]  ;;  %v348_v46 = vld [vmem:[%s2168_s0 + $0x72] sm:$0xff] }
  0x1b   :  { %v94_v41 = vld [vmem:[%s2168_s0 + $0x61] sm:$0xff]  ;;  %v95_v44 = vld [vmem:[%s2168_s0 + $0x69] sm:$0xff]  ;;  %v96_v47 = vld [vmem:[%s2168_s0 + $0x71] sm:$0xff] }
  0x1c   :  { %v77_v42 = vld [vmem:[%s2168_s0 + $0x60] sm:$0xff]  ;;  %v78_v45 = vld [vmem:[%s2168_s0 + $0x68] sm:$0xff]  ;;  %v79_v48 = vld [vmem:[%s2168_s0 + $0x70] sm:$0xff] }
  0x1d   :  { %v349_v49 = vld [vmem:[%s2168_s0 + $0x7a] sm:$0x3]  ;;  %v80_v51 = vld [vmem:[%s2168_s0 + $0x78] sm:$0x3]  ;;  %v1965_v56 = vld [vmem:[%s2170_s2] ss:$0 sm:$0xff] }
  0x1e   :  { %1531 = vmatmul.msk.f32.gmra.mxu1 %vm100_vm1, %v66_v9  ;;  %s1699_s0 = smov 96  }
  0x1f   :  { %1550 = vmatmul.msk.f32.gmra.mxu2 %vm100_vm1, %v336_v10 }
  0x20   :  { %1515 = vmatmul.msk.f32.gmra.mxu0 %vm100_vm1, %v84_v11 }
  0x26   :  { %1532 = vmatmul.msk.f32.gmra.mxu1 %vm100_vm1, %v67_v12 }
  0x27   :  { %1551 = vmatmul.msk.f32.gmra.mxu2 %vm100_vm1, %v337_v13 }
  0x28   :  { %1516 = vmatmul.msk.f32.gmra.mxu0 %vm100_vm1, %v85_v14 }
  0x2e   :  { %1533 = vmatmul.msk.f32.gmra.mxu1 %vm100_vm1, %v68_v15 }
  0x2f   :  { %1552 = vmatmul.msk.f32.gmra.mxu2 %vm100_vm1, %v338_v16 }
  0x30   :  { %1517 = vmatmul.msk.f32.gmra.mxu0 %vm100_vm1, %v86_v17 }
  0x36   :  { %1534 = vmatmul.msk.f32.gmra.mxu1 %vm100_vm1, %v69_v18 }
  0x37   :  { %1553 = vmatmul.msk.f32.gmra.mxu2 %vm100_vm1, %v339_v19 }
  0x38   :  { %1518 = vmatmul.msk.f32.gmra.mxu0 %vm100_vm1, %v87_v20 }
  0x3e   :  { %1535 = vmatmul.msk.f32.gmra.mxu1 %vm100_vm1, %v70_v21 }
  0x3f   :  { %1554 = vmatmul.msk.f32.gmra.mxu2 %vm100_vm1, %v340_v22 }
  0x40   :  { %1519 = vmatmul.msk.f32.gmra.mxu0 %vm100_vm1, %v88_v23 }
  0x46   :  { %1536 = vmatmul.msk.f32.gmra.mxu1 %vm100_vm1, %v71_v24 }
  0x47   :  { %1555 = vmatmul.msk.f32.gmra.mxu2 %vm100_vm1, %v341_v25 }
  0x48   :  { %1520 = vmatmul.msk.f32.gmra.mxu0 %vm100_vm1, %v89_v26 }
  0x4e   :  { %1537 = vmatmul.msk.f32.gmra.mxu1 %vm100_vm1, %v72_v27 }
  0x4f   :  { %1556 = vmatmul.msk.f32.gmra.mxu2 %vm100_vm1, %v342_v28 }
  0x50   :  { %1521 = vmatmul.msk.f32.gmra.mxu0 %vm100_vm1, %v90_v29 }
  0x56   :  { %1538 = vmatmul.msk.f32.gmra.mxu1 %vm100_vm1, %v73_v30 }
  0x57   :  { %1557 = vmatmul.msk.f32.gmra.mxu2 %vm100_vm1, %v343_v31 }
  0x58   :  { %1522 = vmatmul.msk.f32.gmra.mxu0 %vm100_vm1, %v91_v32 }
  0x5e   :  { %1539 = vmatmul.msk.f32.gmra.mxu1 %vm100_vm1, %v74_v33 }
  0x5f   :  { %1558 = vmatmul.msk.f32.gmra.mxu2 %vm100_vm1, %v344_v34 }
  0x60   :  { %1523 = vmatmul.msk.f32.gmra.mxu0 %vm100_vm1, %v92_v35 }
  0x66   :  { %1540 = vmatmul.msk.f32.gmra.mxu1 %vm100_vm1, %v75_v36 }
  0x67   :  { %1559 = vmatmul.msk.f32.gmra.mxu2 %vm100_vm1, %v345_v37 }
  0x68   :  { %1524 = vmatmul.msk.f32.gmra.mxu0 %vm100_vm1, %v93_v38 }
  0x6e   :  { %1541 = vmatmul.msk.f32.gmra.mxu1 %vm100_vm1, %v76_v39 }
  0x6f   :  { %1560 = vmatmul.msk.f32.gmra.mxu2 %vm100_vm1, %v346_v40 }
  0x70   :  { %1525 = vmatmul.msk.f32.gmra.mxu0 %vm100_vm1, %v94_v41 }
  0x76   :  { %1542 = vmatmul.msk.f32.gmra.mxu1 %vm100_vm1, %v77_v42 }
  0x77   :  { %1561 = vmatmul.msk.f32.gmra.mxu2 %vm100_vm1, %v347_v43 }
  0x78   :  { %1526 = vmatmul.msk.f32.gmra.mxu0 %vm100_vm1, %v95_v44 }
  0x7e   :  { %1543 = vmatmul.msk.f32.gmra.mxu1 %vm100_vm1, %v78_v45 }
  0x7f   :  { %1562 = vmatmul.msk.f32.gmra.mxu2 %vm100_vm1, %v348_v46 }
  0x80   :  { %1527 = vmatmul.msk.f32.gmra.mxu0 %vm100_vm1, %v96_v47 }
  0x86   :  { %1544 = vmatmul.msk.f32.gmra.mxu1 %vm100_vm1, %v79_v48 }
  0x87   :  { %1563 = vmatmul.msk.f32.gmra.mxu2 %vm100_vm1, %v349_v49 }
  0x8b   :  { %v1956_v50 = vpop.f32.mrf.mxu1 }
  0x8d   :  { %v170_v52 = vpop.f32.mrf.mxu0 }
  0x8e   :  { %1545 = vmatmul.msk.f32.gmra.mxu1 %vm100_vm1, %v80_v51 }
  0x92   :  { %v420_v53 = vpop.f32.mrf.mxu2 }
  0x93   :  { %v286_v54 = vpop.f32.mrf.mxu1 }
  0x94   :  { %v287_v55 = vadd.f32 %v286_v54, %v170_v52 }
  0x95   :  { %v173_v57 = vpop.f32.mrf.mxu0 }
  0x96   :  { %v468_v58 = vadd.f32 %v420_v53, %v287_v55 }
  0x98   :  { %v488_v59 = vadd.f32 %v1965_v56, %v468_v58 }
  0x9a   :  { %v504_v60 = vmax.f32 %v488_v59, 0.0  ;;  %v423_v61 = vpop.f32.mrf.mxu2 }
  0x9b   :  { %v289_v62 = vpop.f32.mrf.mxu1 }
  0x9c   :  { %520 = vst [vmem:[#allocation2] sm:$0xff] %v504_v60  ;;  %v290_v63 = vadd.f32 %v289_v62, %v173_v57 }
  0x9d   :  { %v176_v0 = vpop.f32.mrf.mxu0 }
  0x9e   :  { %v469_v1 = vadd.f32 %v423_v61, %v290_v63 }
  0xa0   :  { %v489_v2 = vadd.f32 %v1965_v56, %v469_v1 }
  0xa2   :  { %v505_v3 = vmax.f32 %v489_v2, 0.0  ;;  %v426_v4 = vpop.f32.mrf.mxu2 }
  0xa3   :  { %v292_v5 = vpop.f32.mrf.mxu1 }
  0xa4   :  { %521 = vst [vmem:[#allocation2 + $0x8] sm:$0xff] %v505_v3  ;;  %v293_v6 = vadd.f32 %v292_v5, %v176_v0 }
  0xa5   :  { %v179_v7 = vpop.f32.mrf.mxu0 }
  0xa6   :  { %v470_v8 = vadd.f32 %v426_v4, %v293_v6 }
  0xa8   :  { %v490_v9 = vadd.f32 %v1965_v56, %v470_v8 }
  0xaa   :  { %v506_v10 = vmax.f32 %v490_v9, 0.0  ;;  %v429_v11 = vpop.f32.mrf.mxu2 }
  0xab   :  { %v295_v12 = vpop.f32.mrf.mxu1  ;;  %v539_v13 = vld [vmem:[#allocation2] ss:$2 sm:$0xff]  ;;  %v547_v14 = vld [vmem:[#allocation2 + $0x1] ss:$2 sm:$0xff] }
  0xac   :  { %522 = vst [vmem:[#allocation2 + $0x10] sm:$0xff] %v506_v10  ;;  %v296_v15 = vadd.f32 %v295_v12, %v179_v7  ;;  %v1970_v16 = vmax.f32 %v539_v13, %v547_v14 }
  0xad   :  { %v182_v17 = vpop.f32.mrf.mxu0 }
  0xae   :  { %v471_v18 = vadd.f32 %v429_v11, %v296_v15  ;;  %562 = vrot.lane.b32.xlu0 %v1970_v16, %s1699_s0 }
  0xb0   :  { %v491_v19 = vadd.f32 %v1965_v56, %v471_v18 }
  0xb2   :  { %v507_v20 = vmax.f32 %v491_v19, 0.0  ;;  %v432_v21 = vpop.f32.mrf.mxu2 }
  0xb3   :  { %v298_v22 = vpop.f32.mrf.mxu1 }
  0xb4   :  { %523 = vst [vmem:[#allocation2 + $0x18] sm:$0xff] %v507_v20  ;;  %v299_v23 = vadd.f32 %v298_v22, %v182_v17 }
  0xb5   :  { %v185_v24 = vpop.f32.mrf.mxu0 }
  0xb6   :  { %v472_v25 = vadd.f32 %v432_v21, %v299_v23 }
  0xb8   :  { %v492_v26 = vadd.f32 %v1965_v56, %v472_v25 }
  0xba   :  { %v508_v27 = vmax.f32 %v492_v26, 0.0  ;;  %v435_v28 = vpop.f32.mrf.mxu2 }
  0xbb   :  { %v301_v29 = vpop.f32.mrf.mxu1  ;;  %v541_v30 = vld [vmem:[#allocation2 + $0x10] ss:$2 sm:$0xff]  ;;  %v549_v31 = vld [vmem:[#allocation2 + $0x11] ss:$2 sm:$0xff] }
  0xbc   :  { %524 = vst [vmem:[#allocation2 + $0x20] sm:$0xff] %v508_v27  ;;  %v302_v32 = vadd.f32 %v301_v29, %v185_v24  ;;  %v1976_v33 = vmax.f32 %v541_v30, %v549_v31  ;;  %v670_v30 = vld [vmem:[#allocation6 + $0xb8] sm:$0xff] }
  0xbd   :  { %v188_v34 = vpop.f32.mrf.mxu0  ;;  %699 = vmatpush.msra.mxu3 %v670_v30 }
  0xbe   :  { %v473_v35 = vadd.f32 %v435_v28, %v302_v32  ;;  %564 = vrot.lane.b32.xlu0 %v1976_v33, %s1699_s0  ;;  %v669_v32 = vld [vmem:[#allocation6 + $0xb0] sm:$0xff] }
  0xbf   :  { %700 = vmatpush.msra.mxu3 %v669_v32 }
  0xc0   :  { %v493_v36 = vadd.f32 %v1965_v56, %v473_v35 }
  0xc2   :  { %v509_v37 = vmax.f32 %v493_v36, 0.0  ;;  %v438_v38 = vpop.f32.mrf.mxu2 }
  0xc3   :  { %v304_v39 = vpop.f32.mrf.mxu1 }
  0xc4   :  { %525 = vst [vmem:[#allocation2 + $0x28] sm:$0xff] %v509_v37  ;;  %v305_v40 = vadd.f32 %v304_v39, %v188_v34  ;;  %v668_v34 = vld [vmem:[#allocation6 + $0xa8] sm:$0xff]  ;;  %v667_v37 = vld [vmem:[#allocation6 + $0xa0] sm:$0xff]  ;;  %v666_v39 = vld [vmem:[#allocation6 + $0x98] sm:$0xff] }
  0xc5   :  { %v191_v41 = vpop.f32.mrf.mxu0  ;;  %701 = vmatpush.msra.mxu3 %v668_v34 }
  0xc6   :  { %v474_v42 = vadd.f32 %v438_v38, %v305_v40 }
  0xc7   :  { %702 = vmatpush.msra.mxu3 %v667_v37 }
  0xc8   :  { %v494_v43 = vadd.f32 %v1965_v56, %v474_v42 }
  0xc9   :  { %703 = vmatpush.msra.mxu3 %v666_v39  ;;  %v648_v39 = vld [vmem:[#allocation6 + $0x50] sm:$0xff] }
  0xca   :  { %v510_v44 = vmax.f32 %v494_v43, 0.0  ;;  %v441_v45 = vpop.f32.mrf.mxu2 }
  0xcb   :  { %v307_v46 = vpop.f32.mrf.mxu1  ;;  %v543_v47 = vld [vmem:[#allocation2 + $0x20] ss:$2 sm:$0xff]  ;;  %v551_v48 = vld [vmem:[#allocation2 + $0x21] ss:$2 sm:$0xff] }
  0xcc   :  { %526 = vst [vmem:[#allocation2 + $0x30] sm:$0xff] %v510_v44  ;;  %v308_v49 = vadd.f32 %v307_v46, %v191_v41  ;;  %v1982_v51 = vmax.f32 %v543_v47, %v551_v48 }
  0xcd   :  { %v194_v52 = vpop.f32.mrf.mxu0 }
  0xce   :  { %v475_v53 = vadd.f32 %v441_v45, %v308_v49  ;;  %566 = vrot.lane.b32.xlu1 %v1982_v51, %s1699_s0  ;;  %v665_v45 = vld [vmem:[#allocation6 + $0x90] sm:$0xff]  ;;  %v664_v49 = vld [vmem:[#allocation6 + $0x88] sm:$0xff] }
  0xcf   :  { %704 = vmatpush.msra.mxu3 %v665_v45  ;;  %v644_v45 = vld [vmem:[#allocation6 + $0x30] sm:$0xff] }
  0xd0   :  { %v495_v54 = vadd.f32 %v1965_v56, %v475_v53 }
  0xd1   :  { %705 = vmatpush.msra.mxu3 %v664_v49 }
  0xd2   :  { %v511_v55 = vmax.f32 %v495_v54, 0.0  ;;  %v444_v57 = vpop.f32.mrf.mxu2  ;;  %v663_v54 = vld [vmem:[#allocation6 + $0x80] sm:$0xff] }
  0xd3   :  { %v310_v58 = vpop.f32.mrf.mxu1  ;;  %706 = vmatpush.msra.mxu3 %v663_v54 }
  0xd4   :  { %527 = vst [vmem:[#allocation2 + $0x38] sm:$0xff] %v511_v55  ;;  %v311_v59 = vadd.f32 %v310_v58, %v194_v52 }
  0xd5   :  { %v197_v60 = vpop.f32.mrf.mxu0 }
  0xd6   :  { %v476_v61 = vadd.f32 %v444_v57, %v311_v59  ;;  %v662_v59 = vld [vmem:[#allocation6 + $0x78] sm:$0xff] }
  0xd7   :  { %707 = vmatpush.msra.mxu3 %v662_v59  ;;  %v641_v59 = vld [vmem:[#allocation6 + $0x18] sm:$0xff] }
  0xd8   :  { %v496_v62 = vadd.f32 %v1965_v56, %v476_v61  ;;  %v661_v61 = vld [vmem:[#allocation6 + $0x70] sm:$0xff] }
  0xd9   :  { %708 = vmatpush.msra.mxu3 %v661_v61  ;;  %v639_v61 = vld [vmem:[#allocation6 + $0x8] sm:$0xff] }
  0xda   :  { %v512_v63 = vmax.f32 %v496_v62, 0.0  ;;  %v447_v0 = vpop.f32.mrf.mxu2  ;;  %v1700_v62 = vmov 0.0  }
  0xdb   :  { %v313_v1 = vpop.f32.mrf.mxu1  ;;  %v545_v2 = vld [vmem:[#allocation2 + $0x30] ss:$2 sm:$0x3f]  ;;  %v553_v3 = vld [vmem:[#allocation2 + $0x31] ss:$2 sm:$0x3f] }
  0xdc   :  { %528 = vst [vmem:[#allocation2 + $0x40] sm:$0xff] %v512_v63  ;;  %v314_v4 = vadd.f32 %v313_v1, %v197_v60  ;;  %v1988_v5 = vmax.f32 %v545_v2, %v553_v3  ;;  %v821_v60 = vld [vmem:[#allocation6 + $0x118] sm:$0xff]  ;;  %v660_v1 = vld [vmem:[#allocation6 + $0x68] sm:$0xff] }
  0xdd   :  { %v200_v6 = vpop.f32.mrf.mxu0  ;;  %538 = vst.msk [vmem:[#allocation3 + $0x1f] sm:$0x1] %vm536_vm2, %v1700_v62  ;;  %850 = vmatpush.msrb.mxu0 %v821_v60  ;;  %v819_v2 = vld [vmem:[#allocation6 + $0x108] sm:$0xff]  ;;  %709 = vmatpush.msra.mxu3 %v660_v1  ;;  %v640_v60 = vld [vmem:[#allocation6 + $0x10] sm:$0xff] }
  0xde   :  { %v477_v7 = vadd.f32 %v447_v0, %v314_v4  ;;  %568 = vrot.lane.b32.xlu1 %v1988_v5, %s1699_s0  ;;  %v820_v0 = vld [vmem:[#allocation6 + $0x110] sm:$0xff]  ;;  %584 = vst.msk [vmem:[#allocation3 + $0x20] sm:$0x1] %vm536_vm2, %v1700_v62  ;;  %v659_v4 = vld [vmem:[#allocation6 + $0x60] sm:$0xff] }
  0xdf   :  { %851 = vmatpush.msrb.mxu0 %v820_v0  ;;  %537 = vst.msk [vmem:[#allocation3] sm:$0x1] %vm536_vm2, %v1700_v62  ;;  %710 = vmatpush.msra.mxu3 %v659_v4 }
  0xe0   :  { %v497_v8 = vadd.f32 %v1965_v56, %v477_v7  ;;  %585 = vst.msk [vmem:[#allocation3 + $0x3f] sm:$0x1] %vm536_vm2, %v1700_v62  ;;  %v638_v62 = vld [vmem:[#allocation6] sm:$0xff] }
  0xe1   :  { %852 = vmatpush.msrb.mxu0 %v819_v2 }
  0xe2   :  { %v513_v9 = vmax.f32 %v497_v8, 0.0  ;;  %v450_v10 = vpop.f32.mrf.mxu2 }
  0xe3   :  { %v316_v11 = vpop.f32.mrf.mxu1 }
  0xe4   :  { %529 = vst [vmem:[#allocation2 + $0x48] sm:$0xff] %v513_v9  ;;  %v317_v12 = vadd.f32 %v316_v11, %v200_v6  ;;  %v818_v6 = vld [vmem:[#allocation6 + $0x100] sm:$0xff] }
  0xe5   :  { %v203_v13 = vpop.f32.mrf.mxu0  ;;  %853 = vmatpush.msrb.mxu0 %v818_v6 }
  0xe6   :  { %v478_v14 = vadd.f32 %v450_v10, %v317_v12 }
  0xe8   :  { %v498_v15 = vadd.f32 %v1965_v56, %v478_v14 }
  0xea   :  { %v514_v17 = vmax.f32 %v498_v15, 0.0  ;;  %v453_v18 = vpop.f32.mrf.mxu2 }
  0xeb   :  { %v319_v19 = vpop.f32.mrf.mxu1  ;;  %v587_v20 = vld [vmem:[#allocation2 + $0x3e] ss:$2 sm:$0xff]  ;;  %v595_v21 = vld [vmem:[#allocation2 + $0x3f] ss:$2 sm:$0xff] }
  0xec   :  { %530 = vst [vmem:[#allocation2 + $0x50] sm:$0xff] %v514_v17  ;;  %v320_v22 = vadd.f32 %v319_v19, %v203_v13  ;;  %v1994_v23 = vmax.f32 %v587_v20, %v595_v21  ;;  %v817_v13 = vld [vmem:[#allocation6 + $0xf8] sm:$0xff]  ;;  %v816_v17 = vld [vmem:[#allocation6 + $0xf0] sm:$0xff]  ;;  %v814_v21 = vld [vmem:[#allocation6 + $0xe0] sm:$0xff] }
  0xed   :  { %v206_v24 = vpop.f32.mrf.mxu0  ;;  %854 = vmatpush.msrb.mxu0 %v817_v13 }
  0xee   :  { %v479_v25 = vadd.f32 %v453_v18, %v320_v22  ;;  %610 = vrot.lane.b32.xlu2 %v1994_v23, %s1699_s0  ;;  %v815_v18 = vld [vmem:[#allocation6 + $0xe8] sm:$0xff] }
  0xef   :  { %855 = vmatpush.msrb.mxu0 %v816_v17 }
  0xf0   :  { %v499_v26 = vadd.f32 %v1965_v56, %v479_v25  ;;  %v812_v25 = vld [vmem:[#allocation6 + $0xd0] sm:$0xff] }
  0xf1   :  { %856 = vmatpush.msrb.mxu0 %v815_v18 }
  0xf2   :  { %v515_v27 = vmax.f32 %v499_v26, 0.0  ;;  %v456_v28 = vpop.f32.mrf.mxu2  ;;  %v810_v26 = vld [vmem:[#allocation6 + $0xc0] sm:$0xff] }
  0xf3   :  { %v322_v29 = vpop.f32.mrf.mxu1  ;;  %857 = vmatpush.msrb.mxu0 %v814_v21 }
  0xf4   :  { %531 = vst [vmem:[#allocation2 + $0x58] sm:$0xff] %v515_v27  ;;  %v323_v31 = vadd.f32 %v322_v29, %v206_v24  ;;  %v813_v24 = vld [vmem:[#allocation6 + $0xd8] sm:$0xff] }
  0xf5   :  { %v209_v36 = vpop.f32.mrf.mxu0  ;;  %858 = vmatpush.msrb.mxu0 %v813_v24 }
  0xf6   :  { %v480_v35 = vadd.f32 %v456_v28, %v323_v31 }
  0xf7   :  { %859 = vmatpush.msrb.mxu0 %v812_v25 }
  0xf8   :  { %v500_v38 = vadd.f32 %v1965_v56, %v480_v35 }
  0xfa   :  { %v516_v40 = vmax.f32 %v500_v38, 0.0  ;;  %v459_v41 = vpop.f32.mrf.mxu2 }
  0xfb   :  { %v325_v42 = vpop.f32.mrf.mxu1  ;;  %v589_v43 = vld [vmem:[#allocation2 + $0x4e] ss:$2 sm:$0xff]  ;;  %v597_v44 = vld [vmem:[#allocation2 + $0x4f] ss:$2 sm:$0xff] }
  0xfc   :  { %532 = vst [vmem:[#allocation2 + $0x60] sm:$0xff] %v516_v40  ;;  %v326_v46 = vadd.f32 %v325_v42, %v209_v36  ;;  %v2000_v47 = vmax.f32 %v589_v43, %v597_v44  ;;  %v647_v43 = vld [vmem:[#allocation6 + $0x48] sm:$0xff]  ;;  %v646_v44 = vld [vmem:[#allocation6 + $0x40] sm:$0xff] }
  0xfd   :  { %v212_v53 = vpop.f32.mrf.mxu0 }
  0xfe   :  { %v481_v48 = vadd.f32 %v459_v41, %v326_v46  ;;  %612 = vrot.lane.b32.xlu2 %v2000_v47, %s1699_s0 }
 0x100   :  { %v501_v52 = vadd.f32 %v1965_v56, %v481_v48 }
 0x102   :  { %v517_v55 = vmax.f32 %v501_v52, 0.0  ;;  %v462_v57 = vpop.f32.mrf.mxu2 }
 0x103   :  { %v328_v58 = vpop.f32.mrf.mxu1 }
 0x104   :  { %533 = vst [vmem:[#allocation2 + $0x68] sm:$0xff] %v517_v55  ;;  %v329_v63 = vadd.f32 %v328_v58, %v212_v53 }
 0x106   :  { %v482_v3 = vadd.f32 %v462_v57, %v329_v63  ;;  %v642_v57 = vld [vmem:[#allocation6 + $0x20] sm:$0xff] }
 0x108   :  { %v502_v7 = vadd.f32 %v1965_v56, %v482_v3 }
 0x10a   :  { %v518_v8 = vmax.f32 %v502_v7, 0.0  ;;  %v465_v10 = vpop.f32.mrf.mxu2 }
 0x10b   :  { %v331_v9 = vpop.f32.mrf.mxu1  ;;  %v591_v11 = vld [vmem:[#allocation2 + $0x5e] ss:$2 sm:$0xff]  ;;  %v599_v12 = vld [vmem:[#allocation2 + $0x5f] ss:$2 sm:$0xff] }
 0x10c   :  { %534 = vst [vmem:[#allocation2 + $0x70] sm:$0xff] %v518_v8  ;;  %v332_v14 = vadd.f32 %v331_v9, %v1956_v50  ;;  %v2011_v15 = vmax.f32 %v591_v11, %v599_v12  ;;  %v811_v50 = vld [vmem:[#allocation6 + $0xc8] sm:$0xff] }
 0x10d   :  { %860 = vmatpush.msrb.mxu0 %v811_v50 }
 0x10e   :  { %v483_v19 = vadd.f32 %v465_v10, %v332_v14  ;;  %614 = vrot.lane.b32.xlu0 %v2011_v15, %s1699_s0 }
 0x10f   :  { %861 = vmatpush.msrb.mxu0 %v810_v26 }
 0x110   :  { %v503_v20 = vadd.f32 %v1965_v56, %v483_v19 }
 0x112   :  { %v519_v22 = vmax.f32 %v503_v20, 0.0 }
 0x114   :  { %535 = vst [vmem:[#allocation2 + $0x78] sm:$0x3] %v519_v22 }
 0x11b   :  { %v593_v27 = vld [vmem:[#allocation2 + $0x6e] ss:$2 sm:$0x3f]  ;;  %v601_v28 = vld [vmem:[#allocation2 + $0x6f] ss:$2 sm:$0x3f] }
 0x11c   :  { %v2016_v29 = vmax.f32 %v593_v27, %v601_v28 }
 0x11e   :  { %616 = vrot.lane.b32.xlu1 %v2016_v29, %s1699_s0 }
 0x120   :  { %v563_v56 = vpop.permute.xlu0 %562 }
 0x121   :  { %v574_v30 = vmax.f32 %v1970_v16, %v563_v56  ;;  %v649_v16 = vld [vmem:[#allocation6 + $0x58] sm:$0xff] }
 0x122   :  { %764 = vmatpush.msrb.mxu3 %v649_v16 }
 0x123   :  { %579 = vst.msk [vmem:[#allocation3 + $0x1] sm:$0xff] %vm578_vm3, %v574_v30 }
 0x124   :  { %765 = vmatpush.msrb.mxu3 %v648_v39 }
 0x126   :  { %766 = vmatpush.msrb.mxu3 %v647_v43 }
 0x128   :  { %767 = vmatpush.msrb.mxu3 %v646_v44 }
 0x12a   :  { %v650_v31 = vld [vmem:[#allocation3 + $0x1] sm:$0xff] }
 0x12b   :  { %1564 = vmatmul.msk.f32.vlgmr.msra.gmra.mxu3 %vm578_vm3, %v650_v31  ;;  %v630_v8 = vld [vmem:[#allocation3] sm:$0xff] }
 0x130   :  { %v565_v32 = vpop.permute.xlu0 %564 }
 0x131   :  { %v575_v34 = vmax.f32 %v1976_v33, %v565_v32 }
 0x133   :  { %580 = vst.msk [vmem:[#allocation3 + $0x9] sm:$0xff] %vm578_vm3, %v575_v34 }
 0x13a   :  { %v651_v35 = vld [vmem:[#allocation3 + $0x9] sm:$0xff] }
 0x13b   :  { %v801_v36 = vld [vmem:[#allocation3 + $0x2] sm:$0xff]  ;;  %1565 = vmatmul.msk.f32.gmra.mxu3 %vm578_vm3, %v651_v35 }
 0x13c   :  { %1580 = vmatmul.msk.f32.vlgmr.msrb.gmra.mxu0 %vm578_vm3, %v801_v36  ;;  %v631_v10 = vld [vmem:[#allocation3 + $0x8] sm:$0xff] }
 0x140   :  { %v567_v37 = vpop.permute.xlu1 %566 }
 0x141   :  { %v576_v38 = vmax.f32 %v1982_v51, %v567_v37  ;;  %v645_v51 = vld [vmem:[#allocation6 + $0x38] sm:$0xff] }
 0x142   :  { %768 = vmatpush.msrb.mxu3 %v645_v51 }
 0x143   :  { %581 = vst.msk [vmem:[#allocation3 + $0x11] sm:$0xff] %vm578_vm3, %v576_v38 }
 0x144   :  { %769 = vmatpush.msrb.mxu3 %v644_v45 }
 0x148   :  { %v611_v40 = vpop.permute.xlu2 %610 }
 0x149   :  { %v622_v33 = vmax.f32 %v1994_v23, %v611_v40 }
 0x14a   :  { %v652_v41 = vld [vmem:[#allocation3 + $0x11] sm:$0xff] }
 0x14b   :  { %v802_v42 = vld [vmem:[#allocation3 + $0xa] sm:$0xff]  ;;  %626 = vst.msk [vmem:[#allocation3 + $0x21] sm:$0xff] %vm578_vm3, %v622_v33  ;;  %1566 = vmatmul.msk.f32.gmra.mxu3 %vm578_vm3, %v652_v41 }
 0x14c   :  { %1581 = vmatmul.msk.f32.gmra.mxu0 %vm578_vm3, %v802_v42  ;;  %v632_v11 = vld [vmem:[#allocation3 + $0x10] sm:$0xff] }
 0x150   :  { %v569_v46 = vpop.permute.xlu1 %568 }
 0x151   :  { %v577_v48 = vmax.f32 %v1988_v5, %v569_v46  ;;  %v643_v5 = vld [vmem:[#allocation6 + $0x28] sm:$0xff] }
 0x152   :  { %v654_v54 = vld [vmem:[#allocation3 + $0x21] sm:$0xff]  ;;  %770 = vmatpush.msrb.mxu3 %v643_v5 }
 0x153   :  { %583 = vst.msk [vmem:[#allocation3 + $0x19] sm:$0x3f] %vm582_vm4, %v577_v48  ;;  %v634_v13 = vld [vmem:[#allocation3 + $0x20] sm:$0xff] }
 0x154   :  { %771 = vmatpush.msrb.mxu3 %v642_v57 }
 0x156   :  { %772 = vmatpush.msrb.mxu3 %v641_v59 }
 0x158   :  { %v613_v23 = vpop.permute.xlu2 %612  ;;  %773 = vmatpush.msrb.mxu3 %v640_v60 }
 0x159   :  { %v623_v49 = vmax.f32 %v2000_v47, %v613_v23 }
 0x15a   :  { %v653_v52 = vld [vmem:[#allocation3 + $0x19] sm:$0xff]  ;;  %774 = vmatpush.msrb.mxu3 %v639_v61 }
 0x15b   :  { %v803_v53 = vld [vmem:[#allocation3 + $0x12] sm:$0xff]  ;;  %627 = vst.msk [vmem:[#allocation3 + $0x29] sm:$0xff] %vm578_vm3, %v623_v49  ;;  %1567 = vmatmul.msk.f32.gmra.mxu3 %vm578_vm3, %v653_v52  ;;  %v804_v55 = vld [vmem:[#allocation3 + $0x1a] sm:$0xff] }
 0x15c   :  { %1582 = vmatmul.msk.f32.gmra.mxu0 %vm578_vm3, %v803_v53  ;;  %775 = vmatpush.msrb.mxu3 %v638_v62  ;;  %v633_v12 = vld [vmem:[#allocation3 + $0x18] sm:$0xff] }
 0x162   :  { %v655_v58 = vld [vmem:[#allocation3 + $0x29] sm:$0xff] }
 0x163   :  { %1568 = vmatmul.msk.f32.gmra.mxu3 %vm578_vm3, %v654_v54  ;;  %v805_v47 = vld [vmem:[#allocation3 + $0x22] sm:$0xff] }
 0x164   :  { %1583 = vmatmul.msk.f32.gmra.mxu0 %vm578_vm3, %v804_v55  ;;  %v635_v14 = vld [vmem:[#allocation3 + $0x28] sm:$0xff] }
 0x16b   :  { %1569 = vmatmul.msk.f32.gmra.mxu3 %vm578_vm3, %v655_v58 }
 0x16c   :  { %1584 = vmatmul.msk.f32.gmra.mxu0 %vm578_vm3, %v805_v47 }
 0x180   :  { %v615_v63 = vpop.permute.xlu0 %614 }
 0x181   :  { %v624_v0 = vmax.f32 %v2011_v15, %v615_v63 }
 0x183   :  { %628 = vst.msk [vmem:[#allocation3 + $0x31] sm:$0xff] %vm578_vm3, %v624_v0 }
 0x18a   :  { %v656_v1 = vld [vmem:[#allocation3 + $0x31] sm:$0xff] }
 0x18b   :  { %v806_v2 = vld [vmem:[#allocation3 + $0x2a] sm:$0xff]  ;;  %1570 = vmatmul.msk.f32.gmra.mxu3 %vm578_vm3, %v656_v1 }
 0x18c   :  { %1585 = vmatmul.msk.f32.gmra.mxu0 %vm578_vm3, %v806_v2  ;;  %v636_v15 = vld [vmem:[#allocation3 + $0x30] sm:$0xff] }
 0x190   :  { %v617_v3 = vpop.permute.xlu1 %616 }
 0x191   :  { %v625_v4 = vmax.f32 %v2016_v29, %v617_v3  ;;  %v2065_v29 = vld [vmem:[%s2172_s4] ss:$0 sm:$0xff]  ;;  %s1701_s4 = smov 64  }
 0x193   :  { %629 = vst.msk [vmem:[#allocation3 + $0x39] sm:$0x3f] %vm582_vm4, %v625_v4 }
 0x19a   :  { %v657_v6 = vld [vmem:[#allocation3 + $0x39] sm:$0x3f] }
 0x19b   :  { %v807_v7 = vld [vmem:[#allocation3 + $0x32] sm:$0xff]  ;;  %1571 = vmatmul.msk.f32.gmra.mxu3 %vm578_vm3, %v657_v6  ;;  %v808_v9 = vld [vmem:[#allocation3 + $0x3a] sm:$0x3f] }
 0x19c   :  { %1586 = vmatmul.msk.f32.gmra.mxu0 %vm578_vm3, %v807_v7  ;;  %v637_v17 = vld [vmem:[#allocation3 + $0x38] sm:$0x3f] }
 0x1a3   :  { %1572 = vmatmul.msk.f32.vlgmr.msrb.gmra.mxu3 %vm578_vm3, %v630_v8 }
 0x1a4   :  { %1587 = vmatmul.msk.f32.gmra.mxu0 %vm578_vm3, %v808_v9 }
 0x1ab   :  { %1573 = vmatmul.msk.f32.gmra.mxu3 %vm578_vm3, %v631_v10 }
 0x1ae   :  { %v712_v18 = vpop.f32.mrf.mxu3 }
 0x1b3   :  { %1574 = vmatmul.msk.f32.gmra.mxu3 %vm578_vm3, %v632_v11 }
 0x1b9   :  { %v863_v26 = vpop.f32.mrf.mxu0 }
 0x1bb   :  { %1575 = vmatmul.msk.f32.gmra.mxu3 %vm578_vm3, %v633_v12 }
 0x1be   :  { %v715_v19 = vpop.f32.mrf.mxu3 }
 0x1c3   :  { %1576 = vmatmul.msk.f32.gmra.mxu3 %vm578_vm3, %v634_v13 }
 0x1c9   :  { %v866_v30 = vpop.f32.mrf.mxu0 }
 0x1cb   :  { %1577 = vmatmul.msk.f32.gmra.mxu3 %vm578_vm3, %v635_v14 }
 0x1ce   :  { %v718_v20 = vpop.f32.mrf.mxu3 }
 0x1d3   :  { %1578 = vmatmul.msk.f32.gmra.mxu3 %vm578_vm3, %v636_v15 }
 0x1d9   :  { %v869_v37 = vpop.f32.mrf.mxu0 }
 0x1db   :  { %1579 = vmatmul.msk.f32.gmra.mxu3 %vm578_vm3, %v637_v17 }
 0x1de   :  { %v721_v21 = vpop.f32.mrf.mxu3 }
 0x1e1   :  { %v872_v42 = vpop.f32.mrf.mxu0 }
 0x1e6   :  { %v724_v22 = vpop.f32.mrf.mxu3 }
 0x1e9   :  { %v875_v53 = vpop.f32.mrf.mxu0 }
 0x1ee   :  { %v727_v24 = vpop.f32.mrf.mxu3 }
 0x209   :  { %v878_v47 = vpop.f32.mrf.mxu0 }
 0x20e   :  { %v730_v25 = vpop.f32.mrf.mxu3 }
 0x219   :  { %v881_v3 = vpop.f32.mrf.mxu0 }
 0x21e   :  { %v2060_v50 = vpop.f32.mrf.mxu3 }
 0x221   :  { %v884_v15 = vpop.f32.mrf.mxu0 }
 0x226   :  { %v777_v27 = vpop.f32.mrf.mxu3 }
 0x227   :  { %v778_v28 = vadd.f32 %v777_v27, %v712_v18 }
 0x229   :  { %v887_v56 = vadd.f32 %v863_v26, %v778_v28 }
 0x22b   :  { %v899_v31 = vadd.f32 %v2065_v29, %v887_v56 }
 0x22d   :  { %v907_v32 = vmax.f32 %v899_v31, 0.0 }
 0x22e   :  { %v780_v34 = vpop.f32.mrf.mxu3 }
 0x22f   :  { %915 = vst [vmem:[#allocation4] sm:$0xff] %v907_v32  ;;  %v781_v35 = vadd.f32 %v780_v34, %v715_v19 }
 0x231   :  { %v888_v36 = vadd.f32 %v866_v30, %v781_v35 }
 0x233   :  { %v900_v38 = vadd.f32 %v2065_v29, %v888_v36 }
 0x235   :  { %v908_v16 = vmax.f32 %v900_v38, 0.0 }
 0x236   :  { %v783_v39 = vpop.f32.mrf.mxu3 }
 0x237   :  { %916 = vst [vmem:[#allocation4 + $0x8] sm:$0xff] %v908_v16  ;;  %v784_v40 = vadd.f32 %v783_v39, %v718_v20 }
 0x239   :  { %v889_v33 = vadd.f32 %v869_v37, %v784_v40 }
 0x23b   :  { %v901_v41 = vadd.f32 %v2065_v29, %v889_v33 }
 0x23d   :  { %v909_v43 = vmax.f32 %v901_v41, 0.0 }
 0x23e   :  { %v786_v44 = vpop.f32.mrf.mxu3  ;;  %v923_v51 = vld [vmem:[#allocation4] ss:$2 sm:$0xff]  ;;  %v927_v45 = vld [vmem:[#allocation4 + $0x1] ss:$2 sm:$0xff] }
 0x23f   :  { %917 = vst [vmem:[#allocation4 + $0x10] sm:$0xff] %v909_v43  ;;  %v787_v46 = vadd.f32 %v786_v44, %v721_v21  ;;  %v930_v48 = vmax.f32 %v923_v51, %v927_v45 }
 0x241   :  { %v890_v23 = vadd.f32 %v872_v42, %v787_v46  ;;  %934 = vrot.lane.b32.xlu2 %v930_v48, %s1701_s4 }
 0x243   :  { %v902_v49 = vadd.f32 %v2065_v29, %v890_v23 }
 0x245   :  { %v910_v52 = vmax.f32 %v902_v49, 0.0 }
 0x246   :  { %v789_v54 = vpop.f32.mrf.mxu3 }
 0x247   :  { %918 = vst [vmem:[#allocation4 + $0x18] sm:$0xff] %v910_v52  ;;  %v790_v55 = vadd.f32 %v789_v54, %v724_v22 }
 0x249   :  { %v891_v5 = vadd.f32 %v875_v53, %v790_v55 }
 0x24b   :  { %v903_v57 = vadd.f32 %v2065_v29, %v891_v5 }
 0x24d   :  { %v911_v58 = vmax.f32 %v903_v57, 0.0 }
 0x24e   :  { %v792_v59 = vpop.f32.mrf.mxu3  ;;  %v925_v60 = vld [vmem:[#allocation4 + $0x10] ss:$2 sm:$0x7f]  ;;  %v929_v61 = vld [vmem:[#allocation4 + $0x11] ss:$2 sm:$0x7f] }
 0x24f   :  { %919 = vst [vmem:[#allocation4 + $0x20] sm:$0xff] %v911_v58  ;;  %v793_v62 = vadd.f32 %v792_v59, %v727_v24  ;;  %v931_v63 = vmax.f32 %v925_v60, %v929_v61  ;;  %v1179_v59 = vld [vmem:[#allocation9 + $0xf8] sm:$0xff] }
 0x250   :  { %v1163_v60 = vld [vmem:[#allocation9 + $0x78] sm:$0xff]  ;;  %1315 = vmatpush.msrb.mxu2 %v1179_v59  ;;  %v1257_v59 = vld [vmem:[#allocation9 + $0x368] sm:$0xff] }
 0x251   :  { %v892_v0 = vadd.f32 %v878_v47, %v793_v62  ;;  %936 = vrot.lane.b32.xlu0 %v931_v63, %s1701_s4  ;;  %1295 = vmatpush.msra.mxu1 %v1163_v60  ;;  %v1256_v60 = vld [vmem:[#allocation9 + $0x360] sm:$0xff] }
 0x253   :  { %v904_v1 = vadd.f32 %v2065_v29, %v892_v0  ;;  %v1178_v0 = vld [vmem:[#allocation9 + $0xf0] sm:$0xff] }
 0x254   :  { %1316 = vmatpush.msrb.mxu2 %v1178_v0  ;;  %v1183_v0 = vld [vmem:[#allocation9 + $0x118] sm:$0xff] }
 0x255   :  { %v912_v2 = vmax.f32 %v904_v1, 0.0  ;;  %v1162_v1 = vld [vmem:[#allocation9 + $0x70] sm:$0xff] }
 0x256   :  { %v795_v4 = vpop.f32.mrf.mxu3  ;;  %1296 = vmatpush.msra.mxu1 %v1162_v1  ;;  %v1203_v1 = vld [vmem:[#allocation9 + $0x1b8] sm:$0xff] }
 0x257   :  { %920 = vst [vmem:[#allocation4 + $0x28] sm:$0xff] %v912_v2  ;;  %v796_v6 = vadd.f32 %v795_v4, %v730_v25  ;;  %v1161_v4 = vld [vmem:[#allocation9 + $0x68] sm:$0xff] }
 0x258   :  { %1297 = vmatpush.msra.mxu1 %v1161_v4  ;;  %v1182_v4 = vld [vmem:[#allocation9 + $0x110] sm:$0xff] }
 0x259   :  { %v893_v7 = vadd.f32 %v881_v3, %v796_v6  ;;  %v1177_v3 = vld [vmem:[#allocation9 + $0xe8] sm:$0xff]  ;;  %v1176_v6 = vld [vmem:[#allocation9 + $0xe0] sm:$0xff] }
 0x25a   :  { %1317 = vmatpush.msrb.mxu2 %v1177_v3  ;;  %v1166_v3 = vld [vmem:[#allocation9 + $0x90] sm:$0xff] }
 0x25b   :  { %v905_v8 = vadd.f32 %v2065_v29, %v893_v7  ;;  %v1160_v7 = vld [vmem:[#allocation9 + $0x60] sm:$0xff] }
 0x25c   :  { %1318 = vmatpush.msrb.mxu2 %v1176_v6  ;;  %1298 = vmatpush.msra.mxu1 %v1160_v7  ;;  %v1202_v6 = vld [vmem:[#allocation9 + $0x1b0] sm:$0xff]  ;;  %v1165_v7 = vld [vmem:[#allocation9 + $0x88] sm:$0xff] }
 0x25d   :  { %v913_v9 = vmax.f32 %v905_v8, 0.0 }
 0x25e   :  { %v798_v10 = vpop.f32.mrf.mxu3  ;;  %v1036_v11 = vld [vmem:[#allocation4 + $0x20] ss:$2 sm:$0xff]  ;;  %v1040_v12 = vld [vmem:[#allocation4 + $0x21] ss:$2 sm:$0xff] }
 0x25f   :  { %921 = vst [vmem:[#allocation4 + $0x30] sm:$0xff] %v913_v9  ;;  %v799_v13 = vadd.f32 %v798_v10, %v2060_v50  ;;  %v1043_v14 = vmax.f32 %v1036_v11, %v1040_v12  ;;  %v1175_v12 = vld [vmem:[#allocation9 + $0xd8] sm:$0xff] }
 0x260   :  { %1319 = vmatpush.msrb.mxu2 %v1175_v12  ;;  %v1164_v12 = vld [vmem:[#allocation9 + $0x80] sm:$0xff] }
 0x261   :  { %v894_v17 = vadd.f32 %v884_v15, %v799_v13  ;;  %1047 = vrot.lane.b32.xlu1 %v1043_v14, %s1701_s4  ;;  %v1159_v13 = vld [vmem:[#allocation9 + $0x58] sm:$0xff] }
 0x262   :  { %1299 = vmatpush.msra.mxu1 %v1159_v13  ;;  %v1180_v13 = vld [vmem:[#allocation9 + $0x100] sm:$0xff] }
 0x263   :  { %v906_v18 = vadd.f32 %v2065_v29, %v894_v17 }
 0x265   :  { %v914_v19 = vmax.f32 %v906_v18, 0.0  ;;  %v1174_v18 = vld [vmem:[#allocation9 + $0xd0] sm:$0xff] }
 0x266   :  { %1320 = vmatpush.msrb.mxu2 %v1174_v18  ;;  %v1243_v18 = vld [vmem:[#allocation9 + $0x2f8] sm:$0xff] }
 0x267   :  { %922 = vst [vmem:[#allocation4 + $0x38] sm:$0x3f] %v914_v19  ;;  %v1158_v19 = vld [vmem:[#allocation9 + $0x50] sm:$0xff] }
 0x268   :  { %1300 = vmatpush.msra.mxu1 %v1158_v19  ;;  %v1253_v19 = vld [vmem:[#allocation9 + $0x348] sm:$0xff] }
 0x26e   :  { %v1038_v20 = vld [vmem:[#allocation4 + $0x30] ss:$2 sm:$0x7f]  ;;  %v1042_v21 = vld [vmem:[#allocation4 + $0x31] ss:$2 sm:$0x7f] }
 0x26f   :  { %v1044_v22 = vmax.f32 %v1038_v20, %v1042_v21  ;;  %v1173_v20 = vld [vmem:[#allocation9 + $0xc8] sm:$0xff] }
 0x270   :  { %v1157_v21 = vld [vmem:[#allocation9 + $0x48] sm:$0xff]  ;;  %1321 = vmatpush.msrb.mxu2 %v1173_v20  ;;  %v1226_v20 = vld [vmem:[#allocation9 + $0x270] sm:$0xff] }
 0x271   :  { %1049 = vrot.lane.b32.xlu2 %v1044_v22, %s1701_s4  ;;  %1301 = vmatpush.msra.mxu1 %v1157_v21  ;;  %v1198_v21 = vld [vmem:[#allocation9 + $0x190] sm:$0xff] }
 0x29b   :  { %v935_v24 = vpop.permute.xlu2 %934 }
 0x29c   :  { %v940_v25 = vmax.f32 %v930_v48, %v935_v24  ;;  %v1156_v24 = vld [vmem:[#allocation9 + $0x40] sm:$0xff] }
 0x29d   :  { %1302 = vmatpush.msra.mxu1 %v1156_v24  ;;  %v1225_v24 = vld [vmem:[#allocation9 + $0x268] sm:$0xff] }
 0x29e   :  { %952 = vst.sshfl [vmem:[#allocation1] sm:$0xff pattern:$0x73625140] %v940_v25  ;;  %v1588_v26 = vrot.slane %v940_v25, 9 }
 0x29f   :  { %943 = vst.msk [vmem:[#allocation5] sm:$0x1] %vm942_vm5, %v940_v25 }
 0x2a0   :  { %947 = vrot.lane.b32.xlu0 %v1588_v26, %s1701_s4  ;;  %v1194_v26 = vld [vmem:[#allocation9 + $0x170] sm:$0xff] }
 0x2a5   :  { %v954_v50 = vld [vmem:[#allocation1 + $0x1] ss:$4 sm:$0xff] }
 0x2a6   :  { %957 = vst.sshfl [vmem:[#allocation1] sm:$0xff pattern:$0x73625140] %v940_v25 }
 0x2a7   :  { %956 = vst.msk [vmem:[#allocation5 + $0x2] sm:$0x1] %vm942_vm5, %v954_v50  ;;  %v1171_v50 = vld [vmem:[#allocation9 + $0xb8] sm:$0xff] }
 0x2ad   :  { %v959_v27 = vld [vmem:[#allocation1 + $0x1] ss:$4 sm:$0xff] }
 0x2ae   :  { %966 = vst.sshfl [vmem:[#allocation1] sm:$0xff pattern:$0x73625140] %v940_v25  ;;  %v1589_v28 = vrot.slane %v959_v27, 9  ;;  %v1155_v27 = vld [vmem:[#allocation9 + $0x38] sm:$0xff] }
 0x2af   :  { %1303 = vmatpush.msra.mxu1 %v1155_v27  ;;  %v1224_v27 = vld [vmem:[#allocation9 + $0x260] sm:$0xff] }
 0x2b0   :  { %962 = vrot.lane.b32.xlu1 %v1589_v28, %s1701_s4 }
 0x2b5   :  { %v968_v29 = vld [vmem:[#allocation1 + $0x2] ss:$4 sm:$0xff] }
 0x2b6   :  { %971 = vst.sshfl [vmem:[#allocation1] sm:$0xff pattern:$0x73625140] %v940_v25 }
 0x2b7   :  { %970 = vst.msk [vmem:[#allocation5 + $0x4] sm:$0x1] %vm942_vm5, %v968_v29  ;;  %v1154_v29 = vld [vmem:[#allocation9 + $0x30] sm:$0xff] }
 0x2b8   :  { %1304 = vmatpush.msra.mxu1 %v1154_v29  ;;  %v1196_v29 = vld [vmem:[#allocation9 + $0x180] sm:$0xff] }
 0x2bd   :  { %v973_v56 = vld [vmem:[#allocation1 + $0x2] ss:$4 sm:$0xff] }
 0x2be   :  { %980 = vst.sshfl [vmem:[#allocation1] sm:$0xff pattern:$0x73625140] %v940_v25  ;;  %v1590_v16 = vrot.slane %v973_v56, 9 }
 0x2c3   :  { %v937_v30 = vpop.permute.xlu0 %936 }
 0x2c4   :  { %v941_v31 = vmax.f32 %v931_v63, %v937_v30  ;;  %v1153_v30 = vld [vmem:[#allocation9 + $0x28] sm:$0xff] }
 0x2c5   :  { %v982_v32 = vld [vmem:[#allocation1 + $0x3] ss:$4 sm:$0xff]  ;;  %1305 = vmatpush.msra.mxu1 %v1153_v30 }
 0x2c6   :  { %985 = vst.sshfl [vmem:[#allocation1] sm:$0xff pattern:$0x73625140] %v940_v25  ;;  %v1592_v34 = vrot.slane %v941_v31, 9  ;;  %v1195_v25 = vld [vmem:[#allocation9 + $0x178] sm:$0xff] }
 0x2c7   :  { %984 = vst.msk [vmem:[#allocation5 + $0x6] sm:$0x1] %vm942_vm5, %v982_v32  ;;  %1335 = vmatpush.msra.mxu3 %v1195_v25  ;;  %v1241_v25 = vld [vmem:[#allocation9 + $0x2e8] sm:$0xff]  ;;  %v1239_v30 = vld [vmem:[#allocation9 + $0x2d8] sm:$0xff] }
 0x2c8   :  { %998 = vrot.lane.b32.xlu2 %v1592_v34, %s1701_s4  ;;  %994 = vst.msk [vmem:[#allocation5 + $0x8] sm:$0x1] %vm942_vm5, %v941_v31 }
 0x2c9   :  { %1336 = vmatpush.msra.mxu3 %v1194_v26  ;;  %v1252_v26 = vld [vmem:[#allocation9 + $0x340] sm:$0xff] }
 0x2cb   :  { %v1050_v35 = vpop.permute.xlu2 %1049 }
 0x2cc   :  { %v2088_v36 = vmax.f32 %v1044_v22, %v1050_v35  ;;  %v1172_v22 = vld [vmem:[#allocation9 + $0xc0] sm:$0xff] }
 0x2cd   :  { %v987_v37 = vld [vmem:[#allocation1 + $0x3] ss:$4 sm:$0xff]  ;;  %1322 = vmatpush.msrb.mxu2 %v1172_v22 }
 0x2ce   :  { %1002 = vst.sshfl [vmem:[#allocation1] sm:$0xff pattern:$0x73625140] %v941_v31  ;;  %v1591_v38 = vrot.slane %v987_v37, 9  ;;  %v1599_v53 = vrot.slane %v2088_v36, 9  ;;  %v1152_v35 = vld [vmem:[#allocation9 + $0x20] sm:$0xff] }
 0x2cf   :  { %1105 = vst.msk [vmem:[#allocation5 + $0x9] sm:$0x1] %vm942_vm5, %v2088_v36  ;;  %1323 = vmatpush.msrb.mxu2 %v1171_v50  ;;  %v1151_v37 = vld [vmem:[#allocation9 + $0x18] sm:$0xff]  ;;  %1306 = vmatpush.msra.mxu1 %v1152_v35  ;;  %v1242_v22 = vld [vmem:[#allocation9 + $0x2f0] sm:$0xff]  ;;  %v1197_v50 = vld [vmem:[#allocation9 + $0x188] sm:$0xff] }
 0x2d0   :  { %990 = vrot.lane.b32.xlu0 %v1591_v38, %s1701_s4  ;;  %976 = vrot.lane.b32.xlu2 %v1590_v16, %s1701_s4  ;;  %v1193_v38 = vld [vmem:[#allocation9 + $0x168] sm:$0xff]  ;;  %v1150_v16 = vld [vmem:[#allocation9 + $0x10] sm:$0xff] }
 0x2d1   :  { %1337 = vmatpush.msra.mxu3 %v1193_v38  ;;  %1307 = vmatpush.msra.mxu1 %v1151_v37  ;;  %v1250_v35 = vld [vmem:[#allocation9 + $0x330] sm:$0xff]  ;;  %v1237_v37 = vld [vmem:[#allocation9 + $0x2c8] sm:$0xff]  ;;  %v1220_v38 = vld [vmem:[#allocation9 + $0x240] sm:$0xff] }
 0x2d3   :  { %v1048_v39 = vpop.permute.xlu1 %1047  ;;  %1308 = vmatpush.msra.mxu1 %v1150_v16  ;;  %v1236_v16 = vld [vmem:[#allocation9 + $0x2c0] sm:$0xff] }
 0x2d4   :  { %v1053_v40 = vmax.f32 %v1043_v14, %v1048_v39  ;;  %v1192_v39 = vld [vmem:[#allocation9 + $0x160] sm:$0xff] }
 0x2d5   :  { %v1004_v33 = vld [vmem:[#allocation1 + $0x1] ss:$4 sm:$0xff]  ;;  %1338 = vmatpush.msra.mxu3 %v1192_v39 }
 0x2d6   :  { %1007 = vst.sshfl [vmem:[#allocation1] sm:$0xff pattern:$0x73625140] %v941_v31  ;;  %v1595_v41 = vrot.slane %v1053_v40, 9 }
 0x2d7   :  { %1006 = vst.msk [vmem:[#allocation5 + $0xa] sm:$0x1] %vm942_vm5, %v1004_v33  ;;  %v1191_v33 = vld [vmem:[#allocation9 + $0x158] sm:$0xff] }
 0x2d8   :  { %1059 = vrot.lane.b32.xlu1 %v1595_v41, %s1701_s4  ;;  %1055 = vst.msk [vmem:[#allocation5 + $0x1] sm:$0x1] %vm942_vm5, %v1053_v40  ;;  %v1259_v41 = vld [vmem:[#allocation9 + $0x378] sm:$0xff]  ;;  %1339 = vmatpush.msra.mxu3 %v1191_v33 }
 0x2d9   :  { %1415 = vmatpush.msra.mxu0 %v1259_v41  ;;  %v1235_v33 = vld [vmem:[#allocation9 + $0x2b8] sm:$0xff]  ;;  %v1218_v41 = vld [vmem:[#allocation9 + $0x230] sm:$0xff] }
 0x2dd   :  { %v1009_v42 = vld [vmem:[#allocation1 + $0x1] ss:$4 sm:$0xff] }
 0x2de   :  { %v1593_v43 = vrot.slane %v1009_v42, 9  ;;  %1016 = vst.sshfl [vmem:[#allocation1] sm:$0xff pattern:$0x73625140] %v941_v31  ;;  %v1149_v42 = vld [vmem:[#allocation9 + $0x8] sm:$0xff] }
 0x2df   :  { %1309 = vmatpush.msra.mxu1 %v1149_v42  ;;  %v1234_v42 = vld [vmem:[#allocation9 + $0x2b0] sm:$0xff] }
 0x2e0   :  { %1012 = vrot.lane.b32.xlu0 %v1593_v43, %s1701_s4  ;;  %v1190_v43 = vld [vmem:[#allocation9 + $0x150] sm:$0xff] }
 0x2e1   :  { %1340 = vmatpush.msra.mxu3 %v1190_v43  ;;  %v1249_v43 = vld [vmem:[#allocation9 + $0x328] sm:$0xff] }
 0x2e5   :  { %v1018_v44 = vld [vmem:[#allocation1 + $0x2] ss:$4 sm:$0xff] }
 0x2e6   :  { %1021 = vst.sshfl [vmem:[#allocation1] sm:$0xff pattern:$0x73625140] %v941_v31 }
 0x2e7   :  { %1020 = vst.msk [vmem:[#allocation5 + $0xc] sm:$0x1] %vm942_vm5, %v1018_v44  ;;  %v1258_v44 = vld [vmem:[#allocation9 + $0x370] sm:$0xff] }
 0x2e8   :  { %1416 = vmatpush.msra.mxu0 %v1258_v44  ;;  %v1217_v44 = vld [vmem:[#allocation9 + $0x228] sm:$0xff] }
 0x2ea   :  { %1417 = vmatpush.msra.mxu0 %v1257_v59  ;;  %v1229_v59 = vld [vmem:[#allocation9 + $0x288] sm:$0xff] }
 0x2ec   :  { %1418 = vmatpush.msra.mxu0 %v1256_v60  ;;  %v1212_v60 = vld [vmem:[#allocation9 + $0x200] sm:$0xff] }
 0x2ed   :  { %v1023_v51 = vld [vmem:[#allocation1 + $0x2] ss:$4 sm:$0xff] }
 0x2ee   :  { %v1594_v45 = vrot.slane %v1023_v51, 9  ;;  %1030 = vst.sshfl [vmem:[#allocation1] sm:$0xff pattern:$0x73625140] %v941_v31  ;;  %v1148_v51 = vld [vmem:[#allocation9] sm:$0xff] }
 0x2ef   :  { %1310 = vmatpush.msra.mxu1 %v1148_v51  ;;  %v1233_v51 = vld [vmem:[#allocation9 + $0x2a8] sm:$0xff] }
 0x2f0   :  { %1026 = vrot.lane.b32.xlu1 %v1594_v45, %s1701_s4  ;;  %v1211_v45 = vld [vmem:[#allocation9 + $0x1f8] sm:$0xff] }
 0x2f1   :  { %1355 = vmatpush.msrb.mxu1 %v1211_v45 }
 0x2f5   :  { %v1032_v46 = vld [vmem:[#allocation1 + $0x3] ss:$4 sm:$0xff] }
 0x2f6   :  { %1063 = vst.sshfl [vmem:[#allocation1] sm:$0xff pattern:$0x73625140] %v1053_v40 }
 0x2f7   :  { %1034 = vst.msk [vmem:[#allocation5 + $0xe] sm:$0x1] %vm942_vm5, %v1032_v46  ;;  %v1189_v46 = vld [vmem:[#allocation9 + $0x148] sm:$0xff] }
 0x2f8   :  { %1341 = vmatpush.msra.mxu3 %v1189_v46  ;;  %v1248_v46 = vld [vmem:[#allocation9 + $0x320] sm:$0xff] }
 0x2fd   :  { %v1065_v48 = vld [vmem:[#allocation1 + $0x1] ss:$4 sm:$0xff] }
 0x2fe   :  { %1068 = vst.sshfl [vmem:[#allocation1] sm:$0xff pattern:$0x73625140] %v1053_v40 }
 0x2ff   :  { %1067 = vst.msk [vmem:[#allocation5 + $0x3] sm:$0x1] %vm942_vm5, %v1065_v48  ;;  %v1210_v48 = vld [vmem:[#allocation9 + $0x1f0] sm:$0xff] }
 0x300   :  { %1356 = vmatpush.msrb.mxu1 %v1210_v48  ;;  %v1216_v48 = vld [vmem:[#allocation9 + $0x220] sm:$0xff] }
 0x305   :  { %v1070_v23 = vld [vmem:[#allocation1 + $0x1] ss:$4 sm:$0xff] }
 0x306   :  { %v1596_v49 = vrot.slane %v1070_v23, 9  ;;  %1077 = vst.sshfl [vmem:[#allocation1] sm:$0xff pattern:$0x73625140] %v1053_v40  ;;  %v1188_v23 = vld [vmem:[#allocation9 + $0x140] sm:$0xff] }
 0x307   :  { %1342 = vmatpush.msra.mxu3 %v1188_v23  ;;  %v1232_v23 = vld [vmem:[#allocation9 + $0x2a0] sm:$0xff] }
 0x308   :  { %1073 = vrot.lane.b32.xlu2 %v1596_v49, %s1701_s4  ;;  %v1209_v49 = vld [vmem:[#allocation9 + $0x1e8] sm:$0xff] }
 0x309   :  { %1357 = vmatpush.msrb.mxu1 %v1209_v49  ;;  %v1215_v49 = vld [vmem:[#allocation9 + $0x218] sm:$0xff] }
 0x30d   :  { %v1079_v52 = vld [vmem:[#allocation1 + $0x2] ss:$4 sm:$0xff] }
 0x30e   :  { %1082 = vst.sshfl [vmem:[#allocation1] sm:$0xff pattern:$0x73625140] %v1053_v40 }
 0x30f   :  { %1081 = vst.msk [vmem:[#allocation5 + $0x5] sm:$0x1] %vm942_vm5, %v1079_v52  ;;  %v1208_v52 = vld [vmem:[#allocation9 + $0x1e0] sm:$0xff] }
 0x310   :  { %1109 = vrot.lane.b32.xlu2 %v1599_v53, %s1701_s4  ;;  %1358 = vmatpush.msrb.mxu1 %v1208_v52  ;;  %v1187_v53 = vld [vmem:[#allocation9 + $0x138] sm:$0xff] }
 0x311   :  { %1343 = vmatpush.msra.mxu3 %v1187_v53  ;;  %v1231_v52 = vld [vmem:[#allocation9 + $0x298] sm:$0xff] }
 0x312   :  { %v948_v54 = vpop.permute.xlu0 %947  ;;  %v1247_v53 = vld [vmem:[#allocation9 + $0x318] sm:$0xff] }
 0x313   :  { %951 = vst.msk [vmem:[#allocation5] sm:$0x1] %vm950_vm6, %v948_v54  ;;  %v1207_v54 = vld [vmem:[#allocation9 + $0x1d8] sm:$0xff] }
 0x314   :  { %1359 = vmatpush.msrb.mxu1 %v1207_v54  ;;  %v1214_v54 = vld [vmem:[#allocation9 + $0x210] sm:$0xff] }
 0x315   :  { %v1084_v55 = vld [vmem:[#allocation1 + $0x2] ss:$4 sm:$0xff] }
 0x316   :  { %v1597_v5 = vrot.slane %v1084_v55, 9  ;;  %1091 = vst.sshfl [vmem:[#allocation1] sm:$0xff pattern:$0x73625140] %v1053_v40  ;;  %v1186_v55 = vld [vmem:[#allocation9 + $0x130] sm:$0xff] }
 0x317   :  { %1344 = vmatpush.msra.mxu3 %v1186_v55  ;;  %v1230_v55 = vld [vmem:[#allocation9 + $0x290] sm:$0xff] }
 0x318   :  { %1087 = vrot.lane.b32.xlu0 %v1597_v5, %s1701_s4  ;;  %v1206_v5 = vld [vmem:[#allocation9 + $0x1d0] sm:$0xff] }
 0x319   :  { %1360 = vmatpush.msrb.mxu1 %v1206_v5  ;;  %v1246_v5 = vld [vmem:[#allocation9 + $0x310] sm:$0xff] }
 0x31d   :  { %v1093_v57 = vld [vmem:[#allocation1 + $0x3] ss:$4 sm:$0xff] }
 0x31e   :  { %1095 = vst.msk [vmem:[#allocation5 + $0x7] sm:$0x1] %vm942_vm5, %v1093_v57  ;;  %v1185_v57 = vld [vmem:[#allocation9 + $0x128] sm:$0xff] }
 0x31f   :  { %1096 = vst.sshfl [vmem:[#allocation1] sm:$0xff pattern:$0x73625140] %v1053_v40  ;;  %v1169_v40 = vld [vmem:[#allocation9 + $0xa8] sm:$0xff]  ;;  %1345 = vmatpush.msra.mxu3 %v1185_v57 }
 0x320   :  { %v1213_v57 = vld [vmem:[#allocation9 + $0x208] sm:$0xff] }
 0x322   :  { %v963_v58 = vpop.permute.xlu1 %962  ;;  %v999_v47 = vpop.permute.xlu2 %998 }
 0x323   :  { %965 = vst.msk [vmem:[#allocation5 + $0x2] sm:$0x1] %vm950_vm6, %v963_v58  ;;  %v1205_v58 = vld [vmem:[#allocation9 + $0x1c8] sm:$0xff] }
 0x324   :  { %1001 = vst.msk [vmem:[#allocation5 + $0x8] sm:$0x1] %vm950_vm6, %v999_v47  ;;  %1361 = vmatpush.msrb.mxu1 %v1205_v58  ;;  %v1168_v47 = vld [vmem:[#allocation9 + $0xa0] sm:$0xff]  ;;  %v1245_v58 = vld [vmem:[#allocation9 + $0x308] sm:$0xff] }
 0x326   :  { %v1098_v61 = vld [vmem:[#allocation1 + $0x3] ss:$4 sm:$0xff] }
 0x327   :  { %v1598_v62 = vrot.slane %v1098_v61, 9  ;;  %1113 = vst.sshfl [vmem:[#allocation1] sm:$0xff pattern:$0x73625140] %v2088_v36  ;;  %v1184_v61 = vld [vmem:[#allocation9 + $0x120] sm:$0xff] }
 0x328   :  { %1346 = vmatpush.msra.mxu3 %v1184_v61 }
 0x329   :  { %1101 = vrot.lane.b32.xlu1 %v1598_v62, %s1701_s4  ;;  %v1204_v62 = vld [vmem:[#allocation9 + $0x1c0] sm:$0xff] }
 0x32a   :  { %v977_v63 = vpop.permute.xlu2 %976  ;;  %1362 = vmatpush.msrb.mxu1 %v1204_v62  ;;  %1347 = vmatpush.msra.mxu3 %v1183_v0 }
 0x32b   :  { %979 = vst.msk [vmem:[#allocation5 + $0x4] sm:$0x1] %vm950_vm6, %v977_v63  ;;  %v1167_v63 = vld [vmem:[#allocation9 + $0x98] sm:$0xff] }
 0x32c   :  { %1363 = vmatpush.msrb.mxu1 %v1203_v1  ;;  %1348 = vmatpush.msra.mxu3 %v1182_v4  ;;  %v1266_v1 = vld [vmem:[#allocation9 + $0x3b0] sm:$0xff]  ;;  %v1265_v4 = vld [vmem:[#allocation9 + $0x3a8] sm:$0xff] }
 0x32e   :  { %v1115_v2 = vld [vmem:[#allocation1 + $0x1] ss:$4 sm:$0xff]  ;;  %1364 = vmatpush.msrb.mxu1 %v1202_v6 }
 0x32f   :  { %1117 = vst.msk [vmem:[#allocation5 + $0xb] sm:$0x1] %vm942_vm5, %v1115_v2  ;;  %v1255_v2 = vld [vmem:[#allocation9 + $0x358] sm:$0xff]  ;;  %v1264_v6 = vld [vmem:[#allocation9 + $0x3a0] sm:$0xff] }
 0x330   :  { %1118 = vst.sshfl [vmem:[#allocation1] sm:$0xff pattern:$0x73625140] %v2088_v36  ;;  %1419 = vmatpush.msra.mxu0 %v1255_v2  ;;  %v1244_v2 = vld [vmem:[#allocation9 + $0x300] sm:$0xff] }
 0x337   :  { %v1120_v8 = vld [vmem:[#allocation1 + $0x1] ss:$4 sm:$0xff] }
 0x338   :  { %v1600_v9 = vrot.slane %v1120_v8, 9  ;;  %1127 = vst.sshfl [vmem:[#allocation1] sm:$0xff pattern:$0x73625140] %v2088_v36  ;;  %v1181_v8 = vld [vmem:[#allocation9 + $0x108] sm:$0xff] }
 0x339   :  { %1349 = vmatpush.msra.mxu3 %v1181_v8 }
 0x33a   :  { %1123 = vrot.lane.b32.xlu0 %v1600_v9, %s1701_s4  ;;  %v1201_v9 = vld [vmem:[#allocation9 + $0x1a8] sm:$0xff] }
 0x33b   :  { %1365 = vmatpush.msrb.mxu1 %v1201_v9  ;;  %1350 = vmatpush.msra.mxu3 %v1180_v13  ;;  %v1262_v9 = vld [vmem:[#allocation9 + $0x390] sm:$0xff] }
 0x33d   :  { %1395 = vmatpush.msrb.mxu3 %v1243_v18 }
 0x33f   :  { %v1129_v10 = vld [vmem:[#allocation1 + $0x2] ss:$4 sm:$0xff]  ;;  %1396 = vmatpush.msrb.mxu3 %v1242_v22 }
 0x340   :  { %1131 = vst.msk [vmem:[#allocation5 + $0xd] sm:$0x1] %vm942_vm5, %v1129_v10  ;;  %v1254_v10 = vld [vmem:[#allocation9 + $0x350] sm:$0xff]  ;;  %v1460_v22 = vld [vmem:[%s2175_s7 + $0x20] sm:$0xff] }
 0x341   :  { %1132 = vst.sshfl [vmem:[#allocation1] sm:$0xff pattern:$0x73625140] %v2088_v36  ;;  %1420 = vmatpush.msra.mxu0 %v1254_v10  ;;  %1397 = vmatpush.msrb.mxu3 %v1241_v25  ;;  %v1261_v10 = vld [vmem:[#allocation9 + $0x388] sm:$0xff]  ;;  %v1458_v25 = vld [vmem:[%s2175_s7 + $0x10] sm:$0xff] }
 0x342   :  { %v991_v11 = vpop.permute.xlu0 %990 }
 0x343   :  { %993 = vst.msk [vmem:[#allocation5 + $0x6] sm:$0x1] %vm950_vm6, %v991_v11  ;;  %1421 = vmatpush.msra.mxu0 %v1253_v19  ;;  %v1463_v19 = vld [vmem:[%s2175_s7 + $0x38] sm:$0xff] }
 0x345   :  { %1422 = vmatpush.msra.mxu0 %v1252_v26  ;;  %v1457_v26 = vld [vmem:[%s2175_s7 + $0x8] sm:$0xff] }
 0x348   :  { %v1134_v14 = vld [vmem:[#allocation1 + $0x2] ss:$4 sm:$0xff] }
 0x349   :  { %v1601_v15 = vrot.slane %v1134_v14, 9  ;;  %1141 = vst.sshfl [vmem:[#allocation1] sm:$0xff pattern:$0x73625140] %v2088_v36  ;;  %v1170_v36 = vld [vmem:[#allocation9 + $0xb0] sm:$0xff]  ;;  %v1200_v14 = vld [vmem:[#allocation9 + $0x1a0] sm:$0xff] }
 0x34a   :  { %v1060_v17 = vpop.permute.xlu1 %1059  ;;  %1324 = vmatpush.msrb.mxu2 %v1170_v36  ;;  %1366 = vmatpush.msrb.mxu1 %v1200_v14  ;;  %v1221_v36 = vld [vmem:[#allocation9 + $0x248] sm:$0xff] }
 0x34b   :  { %1137 = vrot.lane.b32.xlu1 %v1601_v15, %s1701_s4  ;;  %1062 = vst.msk [vmem:[#allocation5 + $0x1] sm:$0x1] %vm950_vm6, %v1060_v17  ;;  %v1199_v15 = vld [vmem:[#allocation9 + $0x198] sm:$0xff] }
 0x34c   :  { %1325 = vmatpush.msrb.mxu2 %v1169_v40  ;;  %v1227_v17 = vld [vmem:[#allocation9 + $0x278] sm:$0xff]  ;;  %1367 = vmatpush.msrb.mxu1 %v1199_v15 }
 0x34d   :  { %v1219_v40 = vld [vmem:[#allocation9 + $0x238] sm:$0xff] }
 0x34e   :  { %1326 = vmatpush.msrb.mxu2 %v1168_v47  ;;  %1368 = vmatpush.msrb.mxu1 %v1198_v21  ;;  %v1267_v47 = vld [vmem:[#allocation9 + $0x3b8] sm:$0xff]  ;;  %v1461_v21 = vld [vmem:[%s2175_s7 + $0x28] sm:$0xff] }
 0x350   :  { %v1143_v28 = vld [vmem:[#allocation1 + $0x3] ss:$4 sm:$0xff]  ;;  %1327 = vmatpush.msrb.mxu2 %v1167_v63  ;;  %1369 = vmatpush.msrb.mxu1 %v1197_v50 }
 0x351   :  { %1145 = vst.msk [vmem:[#allocation5 + $0xf] sm:$0x1] %vm942_vm5, %v1143_v28  ;;  %v1240_v28 = vld [vmem:[#allocation9 + $0x2e0] sm:$0xff]  ;;  %v1456_v50 = vld [vmem:[%s2175_s7] sm:$0xff] }
 0x352   :  { %v1013_v56 = vpop.permute.xlu0 %1012  ;;  %1328 = vmatpush.msrb.mxu2 %v1166_v3  ;;  %1398 = vmatpush.msrb.mxu3 %v1240_v28  ;;  %v1228_v3 = vld [vmem:[#allocation9 + $0x280] sm:$0xff] }
 0x353   :  { %1015 = vst.msk [vmem:[#allocation5 + $0xa] sm:$0x1] %vm950_vm6, %v1013_v56  ;;  %v1223_v56 = vld [vmem:[#allocation9 + $0x258] sm:$0xff]  ;;  %1370 = vmatpush.msrb.mxu1 %v1196_v29 }
 0x354   :  { %1329 = vmatpush.msrb.mxu2 %v1165_v7  ;;  %1399 = vmatpush.msrb.mxu3 %v1239_v30  ;;  %v1263_v7 = vld [vmem:[#allocation9 + $0x398] sm:$0xff] }
 0x356   :  { %1330 = vmatpush.msrb.mxu2 %v1164_v12 }
 0x358   :  { %1375 = vmatpush.msra.mxu2 %v1227_v17 }
 0x35a   :  { %1376 = vmatpush.msra.mxu2 %v1226_v20  ;;  %v1462_v20 = vld [vmem:[%s2175_s7 + $0x30] sm:$0xff] }
 0x35c   :  { %1377 = vmatpush.msra.mxu2 %v1225_v24  ;;  %v1459_v24 = vld [vmem:[%s2175_s7 + $0x18] sm:$0xff] }
 0x35e   :  { %1378 = vmatpush.msra.mxu2 %v1224_v27  ;;  %v1615_v27 = vld [vmem:[%s2174_s6] ss:$0 sm:$0xff] }
 0x360   :  { %1379 = vmatpush.msra.mxu2 %v1223_v56 }
 0x362   :  { %v1027_v31 = vpop.permute.xlu1 %1026  ;;  %v1074_v32 = vpop.permute.xlu2 %1073 }
 0x363   :  { %1029 = vst.msk [vmem:[#allocation5 + $0xc] sm:$0x1] %vm950_vm6, %v1027_v31  ;;  %v1251_v31 = vld [vmem:[#allocation9 + $0x338] sm:$0xff] }
 0x364   :  { %1076 = vst.msk [vmem:[#allocation5 + $0x3] sm:$0x1] %vm950_vm6, %v1074_v32  ;;  %1423 = vmatpush.msra.mxu0 %v1251_v31  ;;  %v1222_v32 = vld [vmem:[#allocation9 + $0x250] sm:$0xff] }
 0x365   :  { %1380 = vmatpush.msra.mxu2 %v1222_v32 }
 0x366   :  { %1424 = vmatpush.msra.mxu0 %v1250_v35 }
 0x367   :  { %1381 = vmatpush.msra.mxu2 %v1221_v36 }
 0x368   :  { %1425 = vmatpush.msra.mxu0 %v1249_v43  ;;  %v1616_v43 = vld [vmem:[%s2176_s8] ss:$0 sm:$0xff] }
 0x369   :  { %1382 = vmatpush.msra.mxu2 %v1220_v38 }
 0x36a   :  { %v1110_v34 = vpop.permute.xlu2 %1109  ;;  %1426 = vmatpush.msra.mxu0 %v1248_v46 }
 0x36b   :  { %1112 = vst.msk [vmem:[#allocation5 + $0x9] sm:$0x1] %vm950_vm6, %v1110_v34  ;;  %v1238_v34 = vld [vmem:[#allocation9 + $0x2d0] sm:$0xff]  ;;  %1383 = vmatpush.msra.mxu2 %v1219_v40 }
 0x36c   :  { %1400 = vmatpush.msrb.mxu3 %v1238_v34  ;;  %1427 = vmatpush.msra.mxu0 %v1247_v53 }
 0x36d   :  { %1384 = vmatpush.msra.mxu2 %v1218_v41 }
 0x36e   :  { %1401 = vmatpush.msrb.mxu3 %v1237_v37  ;;  %1428 = vmatpush.msra.mxu0 %v1246_v5 }
 0x36f   :  { %1385 = vmatpush.msra.mxu2 %v1217_v44 }
 0x370   :  { %1402 = vmatpush.msrb.mxu3 %v1236_v16  ;;  %1429 = vmatpush.msra.mxu0 %v1245_v58 }
 0x371   :  { %1386 = vmatpush.msra.mxu2 %v1216_v48 }
 0x372   :  { %1403 = vmatpush.msrb.mxu3 %v1235_v33  ;;  %1430 = vmatpush.msra.mxu0 %v1244_v2 }
 0x373   :  { %1387 = vmatpush.msra.mxu2 %v1215_v49 }
 0x374   :  { %1404 = vmatpush.msrb.mxu3 %v1234_v42 }
 0x375   :  { %1388 = vmatpush.msra.mxu2 %v1214_v54 }
 0x376   :  { %1405 = vmatpush.msrb.mxu3 %v1233_v51 }
 0x377   :  { %1389 = vmatpush.msra.mxu2 %v1213_v57 }
 0x378   :  { %1406 = vmatpush.msrb.mxu3 %v1232_v23 }
 0x379   :  { %1390 = vmatpush.msra.mxu2 %v1212_v60 }
 0x37a   :  { %1407 = vmatpush.msrb.mxu3 %v1231_v52 }
 0x37c   :  { %1408 = vmatpush.msrb.mxu3 %v1230_v55 }
 0x37e   :  { %1409 = vmatpush.msrb.mxu3 %v1229_v59 }
 0x380   :  { %1410 = vmatpush.msrb.mxu3 %v1228_v3 }
 0x38a   :  { %v1088_v11 = vpop.permute.xlu0 %1087 }
 0x38b   :  { %1090 = vst.msk [vmem:[#allocation5 + $0x5] sm:$0x1] %vm950_vm6, %v1088_v11  ;;  %v1260_v11 = vld [vmem:[#allocation9 + $0x380] sm:$0xff] }
 0x39b   :  { %v1102_v39 = vpop.permute.xlu1 %1101 }
 0x39c   :  { %1104 = vst.msk [vmem:[#allocation5 + $0x7] sm:$0x1] %vm950_vm6, %v1102_v39 }
 0x3a3   :  { %v1146_v45 = vld [vmem:[#allocation5] sm:$0xff] }
 0x3a4   :  { %1274 = vst [vmem:[#allocation1] ss:$4 sm:$0xff] %v1146_v45 }
 0x3ab   :  { %v1277_v61 = vld.sshfl [vmem:[#allocation1] sm:$0xff pattern:$0x73625140]  ;;  %v1278_v62 = vld.sshfl [vmem:[#allocation1 + $0x8] sm:$0xff pattern:$0x73625140] }
 0x3ac   :  { %v1124_v63 = vpop.permute.xlu0 %1123  ;;  %1311 = vmatmul.f32.vlgmr.msra.gmra.mxu1 %v1277_v61  ;;  %1331 = vmatmul.f32.vlgmr.msrb.gmra.mxu2 %v1278_v62  ;;  %v1279_v0 = vld.sshfl [vmem:[#allocation1 + $0x10] sm:$0xff pattern:$0x73625140]  ;;  %v1280_v8 = vld.sshfl [vmem:[#allocation1 + $0x18] sm:$0xff pattern:$0x73625140] }
 0x3ad   :  { %1126 = vst.msk [vmem:[#allocation5 + $0xb] sm:$0x1] %vm950_vm6, %v1124_v63  ;;  %1351 = vmatmul.f32.vlgmr.msra.gmra.mxu3 %v1279_v0  ;;  %1443 = vmatpush.msra.mxu1 %v1267_v47 }
 0x3ae   :  { %1479 = vmatpush.msrb.mxu2 %v1463_v19 }
 0x3af   :  { %1444 = vmatpush.msra.mxu1 %v1266_v1 }
 0x3b0   :  { %1480 = vmatpush.msrb.mxu2 %v1462_v20 }
 0x3b1   :  { %1445 = vmatpush.msra.mxu1 %v1265_v4 }
 0x3b2   :  { %1481 = vmatpush.msrb.mxu2 %v1461_v21 }
 0x3b3   :  { %1446 = vmatpush.msra.mxu1 %v1264_v6 }
 0x3b4   :  { %1371 = vmatmul.f32.vlgmr.msrb.gmra.mxu1 %v1280_v8  ;;  %1482 = vmatpush.msrb.mxu2 %v1460_v22 }
 0x3b5   :  { %1447 = vmatpush.msra.mxu1 %v1263_v7 }
 0x3b6   :  { %1483 = vmatpush.msrb.mxu2 %v1459_v24 }
 0x3b7   :  { %1448 = vmatpush.msra.mxu1 %v1262_v9 }
 0x3b8   :  { %1484 = vmatpush.msrb.mxu2 %v1458_v25 }
 0x3b9   :  { %1449 = vmatpush.msra.mxu1 %v1261_v10 }
 0x3ba   :  { %1485 = vmatpush.msrb.mxu2 %v1457_v26 }
 0x3bb   :  { %1450 = vmatpush.msra.mxu1 %v1260_v11 }
 0x3bc   :  { %1486 = vmatpush.msrb.mxu2 %v1456_v50 }
 0x3bd   :  { %v1138_v12 = vpop.permute.xlu1 %1137 }
 0x3be   :  { %1140 = vst.msk [vmem:[#allocation5 + $0xd] sm:$0x1] %vm950_vm6, %v1138_v12 }
 0x3c5   :  { %v1147_v13 = vld [vmem:[#allocation5 + $0x8] sm:$0xff] }
 0x3c6   :  { %1276 = vst [vmem:[#allocation1 + $0x20] ss:$4 sm:$0xff] %v1147_v13 }
 0x3cd   :  { %v1281_v14 = vld.sshfl [vmem:[#allocation1 + $0x20] sm:$0xff pattern:$0x73625140]  ;;  %v1282_v15 = vld.sshfl [vmem:[#allocation1 + $0x28] sm:$0xff pattern:$0x73625140] }
 0x3ce   :  { %1391 = vmatmul.f32.vlgmr.msra.gmra.mxu2 %v1281_v14  ;;  %1411 = vmatmul.f32.vlgmr.msrb.gmra.mxu3 %v1282_v15  ;;  %v1283_v17 = vld.sshfl [vmem:[#allocation1 + $0x30] sm:$0xff pattern:$0x73625140]  ;;  %v1284_v18 = vld.sshfl [vmem:[#allocation1 + $0x38] sm:$0xff pattern:$0x73625140] }
 0x3cf   :  { %1431 = vmatmul.f32.vlgmr.msra.gmra.mxu0 %v1283_v17  ;;  %1602 = vmatmul.msk.f32.vlgmr.msra.gmra.mxu1 %vm1292_vm7, %v1284_v18 }
 0x429   :  { %v1312_v28 = vpop.f32.mrf.mxu1 }
 0x42a   :  { %v1313_v56 = vadd.f32 %v1615_v27, %v1312_v28 }
 0x42f   :  { %v1332_v29 = vpop.f32.mrf.mxu2 }
 0x430   :  { %v1333_v30 = vadd.f32 %v1332_v29, %v1313_v56  ;;  %v1352_v31 = vpop.f32.mrf.mxu3 }
 0x431   :  { %v1372_v34 = vpop.f32.mrf.mxu1 }
 0x432   :  { %v1353_v32 = vadd.f32 %v1352_v31, %v1333_v30 }
 0x434   :  { %v1373_v35 = vadd.f32 %v1372_v34, %v1353_v32 }
 0x44c   :  { %v1432_v39 = vpop.f32.mrf.mxu0  ;;  %v1452_v33 = vpop.f32.mrf.mxu1 }
 0x451   :  { %v1392_v36 = vpop.f32.mrf.mxu2  ;;  %v1412_v38 = vpop.f32.mrf.mxu3 }
 0x452   :  { %v1393_v37 = vadd.f32 %v1392_v36, %v1373_v35 }
 0x454   :  { %v1413_v16 = vadd.f32 %v1412_v38, %v1393_v37 }
 0x456   :  { %v1433_v40 = vadd.f32 %v1432_v39, %v1413_v16 }
 0x458   :  { %v1453_v41 = vadd.f32 %v1452_v33, %v1433_v40 }
 0x45a   :  { %v1455_v42 = vmax.f32 %v1453_v41, 0.0 }
 0x45c   :  { %1603 = vmatmul.msk.f32.vlgmr.msrb.gmra.mxu2 %vm1292_vm7, %v1455_v42 }
 0x4df   :  { %v1488_v44 = vpop.f32.mrf.mxu2 }
 0x4e0   :  { %v1489_v51 = vadd.f32 %v1616_v43, %v1488_v44 }
 0x4e2   :  { %1492 = vst.msk [vmem:[#allocation11] sm:$0x3] %vm1491_vm8, %v1489_v51 }
 0x4e3   :  { %1503 = dma.vmem_to_hbm [thread:$0]  %s1499_s23, 32, %s1501_s26, [#allocation8]  }
 0x4e4   :  { %1693 = dma.done.wait [#allocation8], 32  }
 0x4e5   :  { %1694 = vsyncadd [#allocation8], 4294967264 }
 0x4e6   :  { %1508 = vsyncpa [#allocation7], 1 }
 0x4e7   :  { %1509 = vsyncpa [#allocation10], 1 }
 0x4e8   :  { %1510 = vsyncpa [#allocation8], 1 }

</bundles_post_ra>
